<compile_context>
chip_gen: v7x
topology: tpu7x:2x2x1
jax: 0.10.0
libtpu: 0.0.40
codegen_flags: <defaults>
</compile_context>

<pallas_src>
import functools

import jax
import jax.numpy as jnp
from jax.experimental import pallas as pl
from jax.experimental.pallas import tpu as pltpu


def _round_up(x, m):
    return (x + m - 1) // m * m


def _mlp_kernel(x_ref, bias_ref, *refs):
    """Fused Linear -> ReLU chain for one batch tile.

    x_ref:    (TILE_B, in_dim) activations in VMEM (raw flattened pixels; the
              channel mean is folded into the first weight). f32 or bf16.
    bias_ref: (n_layers, C_h) f32, VMEM-resident (constant index_map).
    refs:     [w0, w1, ..., w_{L-1}, out_ref]
              w_i: (in_i, C_h) bf16, VMEM-resident.
              out_ref: (TILE_B, C_h) f32.
    """
    *w_refs, o_ref = refs
    n_layers = len(w_refs)

    biases = bias_ref[...]                             # (L, C_h) f32, tiny
    h = x_ref[...]
    for i, w_ref in enumerate(w_refs):
        w = w_ref[...]                                 # bf16 (in, out)
        # bf16 MXU operands, f32 accumulation; bias add + ReLU stay in f32.
        h = jnp.dot(h.astype(w.dtype), w,
                    preferred_element_type=jnp.float32) + biases[i:i + 1, :]
        if i < n_layers - 1:                           # final Linear has no ReLU
            h = jnp.maximum(h, 0.0)
    o_ref[...] = h.astype(o_ref.dtype)


def init_mlp_params(key, channels=128, layers=3):
    """nn.Linear-style params (PyTorch conventions): weight (out, in), bias (out,)."""
    dims = [(28 * 28, channels)]
    for _ in range(layers):
        dims.append((channels, channels))
    params = []
    for fan_in, fan_out in dims:
        key, kw, kb = jax.random.split(key, 3)
        bound = 1.0 / jnp.sqrt(float(fan_in))
        w = jax.random.uniform(kw, (fan_out, fan_in), jnp.float32, -bound, bound)
        b = jax.random.uniform(kb, (fan_out,), jnp.float32, -bound, bound)
        params.append((w, b))
    return params


def pack_params_for_kernel(params, in_channels=3):
    """PyTorch (out,in)/(out,) -> kernel layout.

    Returns (weights, biases):
      weights: list of (in_i, C_h) bf16 arrays (layer 0 has the channel-mean
               folded in: mean_c(x) @ W0^T == x_flat @ (tile(W0^T,(3,1)) / 3)),
      biases:  (n_layers, C_h) f32 (all hidden widths are `channels`).
    """
    assert in_channels in (1, 3), "MLP.forward only supports 1- or 3-channel input"
    weights, biases = [], []
    for li, (w, b) in enumerate(params):
        wt = jnp.asarray(w, jnp.float32).T                     # (in, out)
        if li == 0 and in_channels == 3:
            wt = jnp.tile(wt, (3, 1)) / 3.0                    # fold channel mean
        weights.append(wt.astype(jnp.bfloat16))                # MXU operand dtype
        biases.append(jnp.asarray(b, jnp.float32))
    return weights, jnp.stack(biases, axis=0)


def _resident_spec(shape):
    """Constant index_map + single buffer: stays in VMEM, never re-DMA'd."""
    try:
        return pl.BlockSpec(shape, lambda i: (0, 0),
                            pipeline_mode=pl.Buffered(1))
    except TypeError:  # older jax without pipeline_mode/Buffered: fall back
        return pl.BlockSpec(shape, lambda i: (0, 0))


@functools.partial(jax.jit, static_argnames=("tile_b",))
def mlp_forward(x, weights, biases, tile_b=512):
    """x: (B, C, 28, 28) NCHW. weights/biases from pack_params_for_kernel.

    tile_b: batch tile. 512 fits v5e's 16 MiB default scoped VMEM
    (double-buffered f32 x tile ~9.6 MiB + resident bf16 weights ~0.7 MiB);
    v6e callers can pass 1024 (~19.3 MiB x tile under its 32 MiB default).
    """
    B = x.shape[0]
    x2d = x.reshape(B, -1)                             # (B, C*784): free view of NCHW
    if x2d.dtype != jnp.bfloat16:
        # keep bf16 producers bf16 (halves the binding HBM stream);
        # everything else goes through the f32 path of the PyTorch module.
        x2d = x2d.astype(jnp.float32)
    in_dim = x2d.shape[1]
    out_dim = weights[-1].shape[1]

    # Batch tile: multiple of 8 (f32 sublanes), no larger than the batch.
    tb = min(tile_b, _round_up(B, 8))
    # Occupancy: keep >= 2 grid steps when the batch allows it so the
    # "parallel" axis shards across both v7x TensorCores (also trims padding
    # waste when B is just above one tile). Cheap on single-TC v5e/v6e.
    if B > 8:
        tb = min(tb, _round_up(pl.cdiv(B, 2), 8))
    b_pad = _round_up(B, tb)
    if b_pad != B:
        x2d = jnp.pad(x2d, ((0, b_pad - B), (0, 0)))

    in_specs = [pl.BlockSpec((tb, in_dim), lambda i: (i, 0)),   # pipelined x tile
                _resident_spec(biases.shape)]
    for w in weights:
        in_specs.append(_resident_spec(w.shape))

    out = pl.pallas_call(
        _mlp_kernel,
        out_shape=jax.ShapeDtypeStruct((b_pad, out_dim), jnp.float32),
        grid=(pl.cdiv(b_pad, tb),),
        in_specs=in_specs,
        out_specs=pl.BlockSpec((tb, out_dim), lambda i: (i, 0)),
        compiler_params=pltpu.CompilerParams(
            dimension_semantics=("parallel",)),
    )(x2d, biases, *weights)
    return out[:B]


def mlp_reference(x, params):
    """Pure-f32 reference of the PyTorch forward (original param layout)."""
    if x.shape[1] == 3:
        x = jnp.mean(x, axis=1, keepdims=True)
    h = x.reshape(x.shape[0], -1)
    n = len(params)
    for i, (w, b) in enumerate(params):
        h = h @ w.T + b
        if i < n - 1:
            h = jnp.maximum(h, 0.0)
    return h


def mlp_reference_packed(x, weights, biases):
    """Reference with the kernel's exact numerics (bf16 operands, f32 accumulate)."""
    h = x.reshape(x.shape[0], -1).astype(jnp.float32)
    n = len(weights)
    for i, w in enumerate(weights):
        h = jnp.dot(h.astype(w.dtype), w,
                    preferred_element_type=jnp.float32) + biases[i:i + 1, :]
        if i < n - 1:
            h = jnp.maximum(h, 0.0)
    return h


if __name__ == "__main__":
    key = jax.random.PRNGKey(0)
    k_params, k_x = jax.random.split(key)

    channels = 128   # module default; multiple of 128 keeps every matmul lane-dense
    layers = 3
    batch = 100      # small demo batch; not a tile multiple -> exercises padding
                     # and the >=2-grid-step occupancy cap (tb=56, grid=2)

    params = init_mlp_params(k_params, channels=channels, layers=layers)
    weights, biases = pack_params_for_kernel(params, in_channels=3)

    # NCHW input with 3 channels -> forward averages channels then flattens.
    x = jax.random.normal(k_x, (batch, 3, 28, 28), dtype=jnp.float32)

    out = jax.block_until_ready(mlp_forward(x, weights, biases))
    assert out.shape == (batch, channels), out.shape

    # 1) exact-numerics check (same bf16 operands / f32 accumulation, plain XLA).
    ref_bf16 = mlp_reference_packed(x, weights, biases)
    assert jnp.allclose(out, ref_bf16, atol=1e-3, rtol=1e-3), "mismatch vs bf16 reference"

    # 2) semantic check vs the pure-f32 PyTorch forward (bf16 quantization tolerance).
    ref_f32 = mlp_reference(x, params)
    assert float(jnp.max(jnp.abs(out - ref_f32))) < 5e-2, "mismatch vs f32 reference"

    print("KERNEL_OK")
</pallas_src>

<mosaic_0001>
module attributes {stable_mosaic.version = 11 : i64} {
  func.func @_mlp_kernel(%arg0: i32, %arg1: memref<56x2352xf32, #tpu.memory_space<vmem>>, %arg2: memref<4x128xf32, #tpu.memory_space<vmem>>, %arg3: memref<2352x128xbf16, #tpu.memory_space<vmem>>, %arg4: memref<128x128xbf16, #tpu.memory_space<vmem>>, %arg5: memref<128x128xbf16, #tpu.memory_space<vmem>>, %arg6: memref<128x128xbf16, #tpu.memory_space<vmem>>, %arg7: memref<56x128xf32, #tpu.memory_space<vmem>>) attributes {dimension_semantics = [#tpu.dimension_semantics<parallel>], iteration_bounds = array<i64: 2>, scalar_prefetch = 0 : i64, scratch_operands = 0 : i64, tpu.core_type = #tpu.core_type<tc>, window_params = [{transform_indices = @transform_0, window_bounds = array<i64: 56, 2352>}, {pipeline_mode = #tpu.pipeline_mode<synchronous>, transform_indices = @transform_1, window_bounds = array<i64: 4, 128>}, {pipeline_mode = #tpu.pipeline_mode<synchronous>, transform_indices = @transform_2, window_bounds = array<i64: 2352, 128>}, {pipeline_mode = #tpu.pipeline_mode<synchronous>, transform_indices = @transform_3, window_bounds = array<i64: 128, 128>}, {pipeline_mode = #tpu.pipeline_mode<synchronous>, transform_indices = @transform_4, window_bounds = array<i64: 128, 128>}, {pipeline_mode = #tpu.pipeline_mode<synchronous>, transform_indices = @transform_5, window_bounds = array<i64: 128, 128>}, {transform_indices = @transform_6, window_bounds = array<i64: 56, 128>}]} {
    %c0 = arith.constant 0 : index
    %c0_0 = arith.constant 0 : index
    %0 = vector.load %arg2[%c0, %c0_0] : memref<4x128xf32, #tpu.memory_space<vmem>>, vector<4x128xf32>
    %c0_1 = arith.constant 0 : index
    %c0_2 = arith.constant 0 : index
    %1 = vector.load %arg1[%c0_1, %c0_2] : memref<56x2352xf32, #tpu.memory_space<vmem>>, vector<56x2352xf32>
    %c0_3 = arith.constant 0 : index
    %c0_4 = arith.constant 0 : index
    %2 = vector.load %arg3[%c0_3, %c0_4] : memref<2352x128xbf16, #tpu.memory_space<vmem>>, vector<2352x128xbf16>
    %3 = arith.truncf %1 : vector<56x2352xf32> to vector<56x2352xbf16>
    %cst = arith.constant dense<0.000000e+00> : vector<56x128xf32>
    %4 = tpu.matmul %3, %2, %cst {dimension_numbers = #tpu.dot_dimension_numbers<[1], [0], [0], [1], [0, 0, 1, 1], [], []>} : vector<56x2352xbf16>, vector<2352x128xbf16>, vector<56x128xf32> -> vector<56x128xf32>
    %5 = vector.extract_strided_slice %0 {offsets = [0, 0], sizes = [1, 128], strides = [1, 1]} : vector<4x128xf32> to vector<1x128xf32>
    %6 = vector.broadcast %5 : vector<1x128xf32> to vector<56x128xf32>
    %7 = arith.addf %4, %6 : vector<56x128xf32>
    %cst_5 = arith.constant 0.000000e+00 : f32
    %8 = vector.broadcast %cst_5 : f32 to vector<56x128xf32>
    %9 = arith.maximumf %7, %8 : vector<56x128xf32>
    %c0_6 = arith.constant 0 : index
    %c0_7 = arith.constant 0 : index
    %10 = vector.load %arg4[%c0_6, %c0_7] : memref<128x128xbf16, #tpu.memory_space<vmem>>, vector<128x128xbf16>
    %11 = arith.truncf %9 : vector<56x128xf32> to vector<56x128xbf16>
    %cst_8 = arith.constant dense<0.000000e+00> : vector<56x128xf32>
    %12 = tpu.matmul %11, %10, %cst_8 {dimension_numbers = #tpu.dot_dimension_numbers<[1], [0], [0], [1], [0, 0, 1, 1], [], []>} : vector<56x128xbf16>, vector<128x128xbf16>, vector<56x128xf32> -> vector<56x128xf32>
    %13 = vector.extract_strided_slice %0 {offsets = [1, 0], sizes = [1, 128], strides = [1, 1]} : vector<4x128xf32> to vector<1x128xf32>
    %14 = vector.broadcast %13 : vector<1x128xf32> to vector<56x128xf32>
    %15 = arith.addf %12, %14 : vector<56x128xf32>
    %cst_9 = arith.constant 0.000000e+00 : f32
    %16 = vector.broadcast %cst_9 : f32 to vector<56x128xf32>
    %17 = arith.maximumf %15, %16 : vector<56x128xf32>
    %c0_10 = arith.constant 0 : index
    %c0_11 = arith.constant 0 : index
    %18 = vector.load %arg5[%c0_10, %c0_11] : memref<128x128xbf16, #tpu.memory_space<vmem>>, vector<128x128xbf16>
    %19 = arith.truncf %17 : vector<56x128xf32> to vector<56x128xbf16>
    %cst_12 = arith.constant dense<0.000000e+00> : vector<56x128xf32>
    %20 = tpu.matmul %19, %18, %cst_12 {dimension_numbers = #tpu.dot_dimension_numbers<[1], [0], [0], [1], [0, 0, 1, 1], [], []>} : vector<56x128xbf16>, vector<128x128xbf16>, vector<56x128xf32> -> vector<56x128xf32>
    %21 = vector.extract_strided_slice %0 {offsets = [2, 0], sizes = [1, 128], strides = [1, 1]} : vector<4x128xf32> to vector<1x128xf32>
    %22 = vector.broadcast %21 : vector<1x128xf32> to vector<56x128xf32>
    %23 = arith.addf %20, %22 : vector<56x128xf32>
    %cst_13 = arith.constant 0.000000e+00 : f32
    %24 = vector.broadcast %cst_13 : f32 to vector<56x128xf32>
    %25 = arith.maximumf %23, %24 : vector<56x128xf32>
    %c0_14 = arith.constant 0 : index
    %c0_15 = arith.constant 0 : index
    %26 = vector.load %arg6[%c0_14, %c0_15] : memref<128x128xbf16, #tpu.memory_space<vmem>>, vector<128x128xbf16>
    %27 = arith.truncf %25 : vector<56x128xf32> to vector<56x128xbf16>
    %cst_16 = arith.constant dense<0.000000e+00> : vector<56x128xf32>
    %28 = tpu.matmul %27, %26, %cst_16 {dimension_numbers = #tpu.dot_dimension_numbers<[1], [0], [0], [1], [0, 0, 1, 1], [], []>} : vector<56x128xbf16>, vector<128x128xbf16>, vector<56x128xf32> -> vector<56x128xf32>
    %29 = vector.extract_strided_slice %0 {offsets = [3, 0], sizes = [1, 128], strides = [1, 1]} : vector<4x128xf32> to vector<1x128xf32>
    %30 = vector.broadcast %29 : vector<1x128xf32> to vector<56x128xf32>
    %31 = arith.addf %28, %30 : vector<56x128xf32>
    %c0_17 = arith.constant 0 : index
    %c0_18 = arith.constant 0 : index
    %32 = vector.load %arg7[%c0_17, %c0_18] : memref<56x128xf32, #tpu.memory_space<vmem>>, vector<56x128xf32>
    tpu.vector_store %arg7[%c0_17, %c0_18], %31 {strides = array<i32>} : memref<56x128xf32, #tpu.memory_space<vmem>>, vector<56x128xf32>,
    return
  }
  func.func @transform_0(%arg0: i32) -> (i32, i32) {
    %c0_i32 = arith.constant 0 : i32
    %c0_i32_0 = arith.constant 0 : i32
    return %arg0, %c0_i32 : i32, i32
  }
  func.func @transform_1(%arg0: i32) -> (i32, i32) {
    %c0_i32 = arith.constant 0 : i32
    %c0_i32_0 = arith.constant 0 : i32
    %c0_i32_1 = arith.constant 0 : i32
    return %c0_i32, %c0_i32_0 : i32, i32
  }
  func.func @transform_2(%arg0: i32) -> (i32, i32) {
    %c0_i32 = arith.constant 0 : i32
    %c0_i32_0 = arith.constant 0 : i32
    %c0_i32_1 = arith.constant 0 : i32
    return %c0_i32, %c0_i32_0 : i32, i32
  }
  func.func @transform_3(%arg0: i32) -> (i32, i32) {
    %c0_i32 = arith.constant 0 : i32
    %c0_i32_0 = arith.constant 0 : i32
    %c0_i32_1 = arith.constant 0 : i32
    return %c0_i32, %c0_i32_0 : i32, i32
  }
  func.func @transform_4(%arg0: i32) -> (i32, i32) {
    %c0_i32 = arith.constant 0 : i32
    %c0_i32_0 = arith.constant 0 : i32
    %c0_i32_1 = arith.constant 0 : i32
    return %c0_i32, %c0_i32_0 : i32, i32
  }
  func.func @transform_5(%arg0: i32) -> (i32, i32) {
    %c0_i32 = arith.constant 0 : i32
    %c0_i32_0 = arith.constant 0 : i32
    %c0_i32_1 = arith.constant 0 : i32
    return %c0_i32, %c0_i32_0 : i32, i32
  }
  func.func @transform_6(%arg0: i32) -> (i32, i32) {
    %c0_i32 = arith.constant 0 : i32
    %c0_i32_0 = arith.constant 0 : i32
    return %arg0, %c0_i32 : i32, i32
  }
}

</mosaic_0001>

<bundles_post_ra>
// kernel: mlp_forward.1
= control target key start
LH: loop header
LB: loop body
LE: loop exit
PB: predicated region body
PF: predicated region fallthrough
CT: control target
= control target key end

     0   :  { %s3706_s21 = smov 0   ;;  %s4442_s0 = inlined_call_operand.vmem [shape: f32[112,2352], index: 0, kind: input, shape index: {}]   ;;  %s4443_s1 = inlined_call_operand.vmem [shape: f32[4,128], index: 1, kind: input, shape index: {}]   ;;  %s4444_s2 = inlined_call_operand.vmem [shape: bf16[2352,128], index: 2, kind: input, shape index: {}]   ;;  %s4445_s3 = inlined_call_operand.vmem [shape: bf16[128,128], index: 3, kind: input, shape index: {}]   ;;  %s4446_s4 = inlined_call_operand.vmem [shape: bf16[128,128], index: 4, kind: input, shape index: {}]   ;;  %s4447_s5 = inlined_call_operand.vmem [shape: bf16[128,128], index: 5, kind: input, shape index: {}]   ;;  %s4448_s6 = inlined_call_operand.vmem [shape: f32[112,128], index: 6, kind: output, shape index: {}]  }
   0x1 LB: > { %s2794_s22 = sadd.s32 4294967295, %s3669_s21   ;;  %p2798_p0 = scmp.ge.s32.totalorder %s3669_s21, 1  ;;  %s3669_s21 = sphi %s3706_s21, %s16_s21  }
   0x2   : > { %p214_p1 = scmp.lt.s32.totalorder %s3669_s21, 3 }
   0x4   : > { %p215_p2 = pnand %p2798_p0, %p214_p1 }
   0x5   : > { %v3492_v0 = vld [vmem:[%s4444_s2 + $0x40] sm:$0xff] (!%p215_p2)   ;;  %v3496_v4 = vld [vmem:[%s4444_s2 + $0x48] sm:$0xff] (!%p215_p2)   ;;  %v3500_v8 = vld [vmem:[%s4444_s2 + $0x50] sm:$0xff] (!%p215_p2)   ;;  %s245_s27 = smul.u32 (!%p215_p2), 7, %s2794_s22  ;;  %vm1649_vm0 = vcmask (!%p215_p2), 392192  }
   0x6   : > { %218 = sbr.rel (%p215_p2) target bundleno = 1075 (0x433), region = 44  ;;  %v3493_v1 = vld [vmem:[%s4444_s2] sm:$0xff] (!%p215_p2)   ;;  %2978 = vmatprep.subr.bf16.mxu0 (!%p215_p2), %v3492_v0  ;;  %v3497_v5 = vld [vmem:[%s4444_s2 + $0x8] sm:$0xff] (!%p215_p2)   ;;  %v3501_v9 = vld [vmem:[%s4444_s2 + $0x10] sm:$0xff] (!%p215_p2)  }
   0x7   : > { %v3494_v2 = vld [vmem:[%s4444_s2 + $0xc0] sm:$0xff] (!%p215_p2)   ;;  %2979 = vmatpush3.bf16.msra.mxu0 (!%p215_p2), %v3493_v1  ;;  %v3498_v6 = vld [vmem:[%s4444_s2 + $0xc8] sm:$0xff] (!%p215_p2)   ;;  %v3502_v10 = vld [vmem:[%s4444_s2 + $0xd0] sm:$0xff] (!%p215_p2)   ;;  %p246_p3 = scmp.lt.s32.totalorder (!%p215_p2), %s245_s27, 13 }
   0x8   : > { %v3495_v3 = vld [vmem:[%s4444_s2 + $0x80] sm:$0xff] (!%p215_p2)   ;;  %3018 = vmatprep.subr.bf16.mxu1 (!%p215_p2), %v3494_v2  ;;  %2980 = vmatprep.subr.bf16.mxu0 (!%p215_p2), %v3496_v4  ;;  %v3499_v7 = vld [vmem:[%s4444_s2 + $0x88] sm:$0xff] (!%p215_p2)   ;;  %v3503_v11 = vld [vmem:[%s4444_s2 + $0x90] sm:$0xff] (!%p215_p2)  }
   0x9   : > { %3019 = vmatpush3.bf16.msra.mxu1 (!%p215_p2), %v3495_v3  ;;  %v3504_v12 = vld [vmem:[%s4444_s2 + $0x58] sm:$0xff] (!%p215_p2)   ;;  %v3508_v16 = vld [vmem:[%s4444_s2 + $0x60] sm:$0xff] (!%p215_p2)   ;;  %v3512_v20 = vld [vmem:[%s4444_s2 + $0x68] sm:$0xff] (!%p215_p2)  }
   0xa   : > { %3020 = vmatprep.subr.bf16.mxu1 (!%p215_p2), %v3498_v6  ;;  %v3505_v13 = vld [vmem:[%s4444_s2 + $0x18] sm:$0xff] (!%p215_p2)   ;;  %v3509_v17 = vld [vmem:[%s4444_s2 + $0x20] sm:$0xff] (!%p215_p2)   ;;  %v3513_v21 = vld [vmem:[%s4444_s2 + $0x28] sm:$0xff] (!%p215_p2)  }
   0xb   : > { %2981 = vmatpush3.bf16.msra.mxu0 (!%p215_p2), %v3497_v5  ;;  %v3506_v14 = vld [vmem:[%s4444_s2 + $0xd8] sm:$0xff] (!%p215_p2)   ;;  %v3510_v18 = vld [vmem:[%s4444_s2 + $0xe0] sm:$0xff] (!%p215_p2)   ;;  %v3514_v22 = vld [vmem:[%s4444_s2 + $0xe8] sm:$0xff] (!%p215_p2)  }
   0xc   : > { %2982 = vmatprep.subr.bf16.mxu0 (!%p215_p2), %v3500_v8  ;;  %v3507_v15 = vld [vmem:[%s4444_s2 + $0x98] sm:$0xff] (!%p215_p2)   ;;  %v3511_v19 = vld [vmem:[%s4444_s2 + $0xa0] sm:$0xff] (!%p215_p2)   ;;  %v3515_v23 = vld [vmem:[%s4444_s2 + $0xa8] sm:$0xff] (!%p215_p2)  }
   0xd   : > { %3021 = vmatpush3.bf16.msra.mxu1 %v3499_v7  ;;  %s4450_s27 = smov (!%p246_p3, %s245_s27), 13  ;;  %v3516_v24 = vld [vmem:[%s4444_s2 + $0x70] sm:$0xff]   ;;  %v3520_v28 = vld [vmem:[%s4444_s2 + $0x78] sm:$0xff]   ;;  %v3524_v38 = vld [vmem:[%s4444_s2 + $0x140] sm:$0xff]  }
   0xe   : > { %3022 = vmatprep.subr.bf16.mxu1 %v3502_v10  ;;  %s3483_s30 = smul.u32 152, %s4450_s27  ;;  %v3517_v25 = vld [vmem:[%s4444_s2 + $0x30] sm:$0xff]   ;;  %v3521_v29 = vld [vmem:[%s4444_s2 + $0x38] sm:$0xff]   ;;  %v3525_v42 = vld [vmem:[%s4444_s2 + $0x100] sm:$0xff]  }
   0xf   : > { %2983 = vmatpush3.bf16.msra.mxu0 %v3501_v9  ;;  %v3518_v26 = vld [vmem:[%s4444_s2 + $0xf0] sm:$0xff]   ;;  %v3522_v30 = vld [vmem:[%s4444_s2 + $0xf8] sm:$0xff]   ;;  %v3526_v46 = vld [vmem:[%s4444_s2 + $0x1c0] sm:$0xff]  }
  0x10   : > { %2984 = vmatprep.subr.bf16.mxu0 %v3504_v12  ;;  %v3519_v27 = vld [vmem:[%s4444_s2 + $0xb0] sm:$0xff]   ;;  %s3807_s16 = scalar_lea.vmem %s4442_s0, %s3483_s30  ;;  %v3523_v34 = vld [vmem:[%s4444_s2 + $0xb8] sm:$0xff]   ;;  %v3527_v47 = vld [vmem:[%s4444_s2 + $0x180] sm:$0xff]   ;;  %s2800_s30 = sshll.u32 %s4450_s27, 3 }
  0x11   : > { %3023 = vmatpush3.bf16.msra.mxu1 %v3503_v11  ;;  %v261_v31 = vld [vmem:[%s3807_s16 + $0x8] sm:$0xff]  ;;  %v280_v32 = vld [vmem:[%s3807_s16 + $0xa0] sm:$0xff]  ;;  %v279_v36 = vld [vmem:[%s3807_s16 + $0x98] sm:$0xff]  ;;  %s256_s9 = scalar_lea.vmem %s4448_s6, %s2800_s30 }
  0x12   : > { %3024 = vmatprep.subr.bf16.mxu1 %v3506_v14  ;;  %v688_v33 = vpack.c.bf16 %v280_v32, %v261_v31  ;;  %v260_v35 = vld [vmem:[%s3807_s16] sm:$0xff]  ;;  %v263_v39 = vld [vmem:[%s3807_s16 + $0x18] sm:$0xff]  ;;  %v282_v40 = vld [vmem:[%s3807_s16 + $0xb0] sm:$0xff] }
  0x13   : > { %2985 = vmatpush3.bf16.msra.mxu0 %v3505_v13  ;;  %v687_v37 = vpack.c.bf16 %v279_v36, %v260_v35  ;;  %v690_v41 = vpack.c.bf16 %v282_v40, %v263_v39  ;;  %v262_v43 = vld [vmem:[%s3807_s16 + $0x10] sm:$0xff]  ;;  %v281_v44 = vld [vmem:[%s3807_s16 + $0xa8] sm:$0xff]  ;;  %v299_v51 = vld [vmem:[%s3807_s16 + $0x138] sm:$0xff] }
  0x14   : > { %2986 = vmatprep.subr.bf16.mxu0 %v3508_v16  ;;  %1694 = vmatprep.mubr.bf16.mxu0 %v688_v33  ;;  %v689_v45 = vpack.c.bf16 %v281_v44, %v262_v43  ;;  %v3528_v48 = vld [vmem:[%s4444_s2 + $0x148] sm:$0xff]   ;;  %v318_v52 = vld [vmem:[%s3807_s16 + $0x1d0] sm:$0xff]  ;;  %v320_v60 = vld [vmem:[%s3807_s16 + $0x1e0] sm:$0xff] }
  0x15   : > { %3025 = vmatpush3.bf16.msra.mxu1 %v3507_v15  ;;  %1758 = vmatprep.mubr.bf16.mxu1 %v690_v41  ;;  %v3529_v49 = vld [vmem:[%s4444_s2 + $0x108] sm:$0xff]   ;;  %v707_v53 = vpack.c.bf16 %v318_v52, %v299_v51  ;;  %v298_v55 = vld [vmem:[%s3807_s16 + $0x130] sm:$0xff]  ;;  %v300_v63 = vld [vmem:[%s3807_s16 + $0x140] sm:$0xff] }
  0x16   : > { %3026 = vmatprep.subr.bf16.mxu1 %v3510_v18  ;;  %v3530_v50 = vld [vmem:[%s4444_s2 + $0x1c8] sm:$0xff]   ;;  %v3532_v58 = vld [vmem:[%s4444_s2 + $0x150] sm:$0xff]   ;;  %v319_v0 = vld [vmem:[%s3807_s16 + $0x1d8] sm:$0xff] }
  0x17   : > { %2987 = vmatpush3.bf16.msra.mxu0 %v3509_v17  ;;  %v3531_v54 = vld [vmem:[%s4444_s2 + $0x188] sm:$0xff]   ;;  %v3533_v62 = vld [vmem:[%s4444_s2 + $0x110] sm:$0xff]   ;;  %v708_v1 = vpack.c.bf16 %v319_v0, %v300_v63  ;;  %v3536_v4 = vld [vmem:[%s4444_s2 + $0x158] sm:$0xff]  }
  0x18   : > { %2988 = vmatprep.subr.bf16.mxu0 %v3512_v20  ;;  %v317_v56 = vld [vmem:[%s3807_s16 + $0x1c8] sm:$0xff]  ;;  %v3534_v2 = vld [vmem:[%s4444_s2 + $0x1d0] sm:$0xff]   ;;  %v3537_v5 = vld [vmem:[%s4444_s2 + $0x118] sm:$0xff]  }
  0x19   : > { %3027 = vmatpush3.bf16.msra.mxu1 %v3511_v19  ;;  %v706_v57 = vpack.c.bf16 %v317_v56, %v298_v55  ;;  %v301_v59 = vld [vmem:[%s3807_s16 + $0x148] sm:$0xff]  ;;  %v3535_v3 = vld [vmem:[%s4444_s2 + $0x190] sm:$0xff]   ;;  %v3538_v6 = vld [vmem:[%s4444_s2 + $0x1d8] sm:$0xff]  }
  0x1a   : > { %3028 = vmatprep.subr.bf16.mxu1 %v3514_v22  ;;  %v709_v61 = vpack.c.bf16 %v320_v60, %v301_v59  ;;  %v337_v7 = vld [vmem:[%s3807_s16 + $0x268] sm:$0xff]  ;;  %v356_v8 = vld [vmem:[%s3807_s16 + $0x300] sm:$0xff]  ;;  %v3539_v10 = vld [vmem:[%s4444_s2 + $0x198] sm:$0xff]  }
  0x1b   : > { %2989 = vmatpush3.bf16.msra.mxu0 %v3513_v21  ;;  %v726_v9 = vpack.c.bf16 %v356_v8, %v337_v7  ;;  %v336_v11 = vld [vmem:[%s3807_s16 + $0x260] sm:$0xff]  ;;  %v355_v12 = vld [vmem:[%s3807_s16 + $0x2f8] sm:$0xff]  ;;  %v358_v16 = vld [vmem:[%s3807_s16 + $0x310] sm:$0xff] }
  0x1c   : > { %2990 = vmatprep.subr.bf16.mxu0 %v3516_v24  ;;  %v725_v13 = vpack.c.bf16 %v355_v12, %v336_v11  ;;  %v3540_v14 = vld [vmem:[%s4444_s2 + $0x160] sm:$0xff]   ;;  %v339_v15 = vld [vmem:[%s3807_s16 + $0x278] sm:$0xff]  ;;  %v338_v19 = vld [vmem:[%s3807_s16 + $0x270] sm:$0xff] }
  0x1d   : > { %3029 = vmatpush3.bf16.msra.mxu1 %v3515_v23  ;;  %v728_v17 = vpack.c.bf16 %v358_v16, %v339_v15  ;;  %v3541_v18 = vld [vmem:[%s4444_s2 + $0x120] sm:$0xff]   ;;  %v357_v20 = vld [vmem:[%s3807_s16 + $0x308] sm:$0xff]  ;;  %v3548_v32 = vld [vmem:[%s4444_s2 + $0x170] sm:$0xff]  }
  0x1e   : > { %3030 = vmatprep.subr.bf16.mxu1 %v3518_v26  ;;  %v727_v21 = vpack.c.bf16 %v357_v20, %v338_v19  ;;  %v3542_v22 = vld [vmem:[%s4444_s2 + $0x1e0] sm:$0xff]   ;;  %v3544_v24 = vld [vmem:[%s4444_s2 + $0x168] sm:$0xff]   ;;  %v3549_v35 = vld [vmem:[%s4444_s2 + $0x130] sm:$0xff]  }
  0x1f   : > { %2991 = vmatpush3.bf16.msra.mxu0 %v3517_v25  ;;  %v3543_v23 = vld [vmem:[%s4444_s2 + $0x1a0] sm:$0xff]   ;;  %v3545_v25 = vld [vmem:[%s4444_s2 + $0x128] sm:$0xff]   ;;  %v3551_v39 = vld [vmem:[%s4444_s2 + $0x1b0] sm:$0xff]  }
  0x20   : > { %2992 = vmatprep.subr.bf16.mxu0 %v3520_v28  ;;  %v3546_v26 = vld [vmem:[%s4444_s2 + $0x1e8] sm:$0xff]   ;;  %v376_v36 = vld [vmem:[%s3807_s16 + $0x3a0] sm:$0xff]  ;;  %v3552_v40 = vld [vmem:[%s4444_s2 + $0x178] sm:$0xff]  }
  0x21   : > { %3031 = vmatpush3.bf16.msra.mxu1 %v3519_v27  ;;  %v375_v27 = vld [vmem:[%s3807_s16 + $0x398] sm:$0xff]  ;;  %v377_v33 = vld [vmem:[%s3807_s16 + $0x3a8] sm:$0xff]  ;;  %v284_v44 = vld [vmem:[%s3807_s16 + $0xc0] sm:$0xff] }
  0x22   : > { %3032 = vmatprep.subr.bf16.mxu1 %v3522_v30  ;;  %v745_v28 = vpack.c.bf16 %v375_v27, %v375_v27  ;;  %v374_v30 = vld [vmem:[%s3807_s16 + $0x390] sm:$0xff]  ;;  %v3553_v41 = vld [vmem:[%s4444_s2 + $0x138] sm:$0xff]   ;;  %v265_v43 = vld [vmem:[%s3807_s16 + $0x28] sm:$0xff] }
  0x23   : > { %2993 = vmatpush3.bf16.msra.mxu0 %v3521_v29  ;;  %v3547_v29 = vld [vmem:[%s4444_s2 + $0x1a8] sm:$0xff]   ;;  %v744_v31 = vpack.c.bf16 %v374_v30, %v374_v30  ;;  %v267_v51 = vld [vmem:[%s3807_s16 + $0x38] sm:$0xff]  ;;  %v286_v52 = vld [vmem:[%s3807_s16 + $0xd0] sm:$0xff] }
  0x24   : > { %3058 = vmatprep.subr.bf16.mxu0 %v3524_v38  ;;  %v3550_v38 = vld [vmem:[%s4444_s2 + $0x1f0] sm:$0xff]   ;;  %v285_v56 = vld [vmem:[%s3807_s16 + $0xc8] sm:$0xff]  ;;  %v3559_v59 = vld [vmem:[%s4444_s2 + $0x280] sm:$0xff]  }
  0x25   : > { %3033 = vmatpush3.bf16.msra.mxu1 %v3523_v34  ;;  %v747_v34 = vpack.c.bf16 %v377_v33, %v377_v33  ;;  %v266_v55 = vld [vmem:[%s3807_s16 + $0x30] sm:$0xff]  ;;  %v3560_v60 = vld [vmem:[%s4444_s2 + $0x248] sm:$0xff]   ;;  %v303_v63 = vld [vmem:[%s3807_s16 + $0x158] sm:$0xff] }
  0x26   : > { %1695 = vmatmul.mubr.bf16.vlgmr.msra.gmra.mrb[0].mxu0 %v687_v37  ;;  %3098 = vmatprep.subr.bf16.mxu1 %v3526_v46  ;;  %v746_v37 = vpack.c.bf16 %v376_v36, %v376_v36  ;;  %v3555_v46 = vld [vmem:[%s4444_s2 + $0x1b8] sm:$0xff]   ;;  %v322_v0 = vld [vmem:[%s3807_s16 + $0x1f0] sm:$0xff]  ;;  %v305_v7 = vld [vmem:[%s3807_s16 + $0x168] sm:$0xff] }
  0x27   : > { %3059 = vmatpush3.bf16.msra.mxu0 %v3525_v42  ;;  %1702 = vmatprep.mubr.bf16.mxu0 %v707_v53  ;;  %v3554_v42 = vld [vmem:[%s4444_s2 + $0x1f8] sm:$0xff]   ;;  %v694_v53 = vpack.c.bf16 %v286_v52, %v267_v51  ;;  %v324_v8 = vld [vmem:[%s3807_s16 + $0x200] sm:$0xff]  ;;  %v3567_v15 = vld [vmem:[%s4444_s2 + $0x290] sm:$0xff]  }
  0x28   : > { %1759 = vmatmul.mubr.bf16.vlgmr.msra.gmra.mrb[0].mxu1 %v689_v45  ;;  %3060 = vmatprep.subr.bf16.mxu0 %v3528_v48  ;;  %v692_v45 = vpack.c.bf16 %v284_v44, %v265_v43  ;;  %v283_v48 = vld [vmem:[%s3807_s16 + $0xb8] sm:$0xff]  ;;  %v304_v11 = vld [vmem:[%s3807_s16 + $0x160] sm:$0xff]  ;;  %v341_v19 = vld [vmem:[%s3807_s16 + $0x288] sm:$0xff] }
  0x29   : > { %3099 = vmatpush3.bf16.msra.mxu1 %v3527_v47  ;;  %1766 = vmatprep.mubr.bf16.mxu1 %v709_v61  ;;  %v264_v47 = vld [vmem:[%s3807_s16 + $0x20] sm:$0xff]  ;;  %v3561_v61 = vld [vmem:[%s4444_s2 + $0x208] sm:$0xff]   ;;  %v323_v12 = vld [vmem:[%s3807_s16 + $0x1f8] sm:$0xff] }
  0x2a   : > { %3100 = vmatprep.subr.bf16.mxu1 %v3530_v50  ;;  %v3556_v50 = vld [vmem:[%s4444_s2 + $0x240] sm:$0xff]   ;;  %v3568_v16 = vld [vmem:[%s4444_s2 + $0x258] sm:$0xff]   ;;  %v3576_v36 = vld [vmem:[%s4444_s2 + $0x268] sm:$0xff]  }
  0x2b   : > { %3061 = vmatpush3.bf16.msra.mxu0 %v3529_v49  ;;  %v691_v49 = vpack.c.bf16 %v283_v48, %v264_v47  ;;  %v360_v20 = vld [vmem:[%s3807_s16 + $0x320] sm:$0xff]  ;;  %v343_v27 = vld [vmem:[%s3807_s16 + $0x298] sm:$0xff]  ;;  %v3580_v44 = vld [vmem:[%s4444_s2 + $0x270] sm:$0xff]  }
  0x2c   : > { %3062 = vmatprep.subr.bf16.mxu0 %v3532_v58  ;;  %v3558_v58 = vld [vmem:[%s4444_s2 + $0x2c0] sm:$0xff]   ;;  %v3581_v47 = vld [vmem:[%s4444_s2 + $0x230] sm:$0xff]   ;;  %v3584_v52 = vld [vmem:[%s4444_s2 + $0x278] sm:$0xff]  }
  0x2d   : > { %3101 = vmatpush3.bf16.msra.mxu1 %v3531_v54  ;;  %v3557_v54 = vld [vmem:[%s4444_s2 + $0x200] sm:$0xff]   ;;  %v3583_v51 = vld [vmem:[%s4444_s2 + $0x2b0] sm:$0xff]  }
  0x2e   : > { %1703 = vmatmul.mubr.bf16.gmra.mrb[4].mxu0 %v706_v57  ;;  %3102 = vmatprep.subr.bf16.mxu1 %v3534_v2  ;;  %v693_v57 = vpack.c.bf16 %v285_v56, %v266_v55  ;;  %v3563_v2 = vld [vmem:[%s4444_s2 + $0x288] sm:$0xff]   ;;  %v3573_v30 = vld [vmem:[%s4444_s2 + $0x220] sm:$0xff]  }
  0x2f   : > { %3063 = vmatpush3.bf16.msra.mxu0 %v3533_v62  ;;  %1710 = vmatprep.mubr.bf16.mxu0 %v726_v9  ;;  %v3562_v62 = vld [vmem:[%s4444_s2 + $0x2c8] sm:$0xff]   ;;  %v713_v9 = vpack.c.bf16 %v324_v8, %v305_v7  ;;  %v380_v48 = vld [vmem:[%s3807_s16 + $0x3c0] sm:$0xff] }
  0x30   : > { %1767 = vmatmul.mubr.bf16.gmra.mrb[4].mxu1 %v708_v1  ;;  %3064 = vmatprep.subr.bf16.mxu0 %v3536_v4  ;;  %v711_v1 = vpack.c.bf16 %v322_v0, %v303_v63  ;;  %v321_v4 = vld [vmem:[%s3807_s16 + $0x1e8] sm:$0xff]  ;;  %v288_v56 = vld [vmem:[%s3807_s16 + $0xe0] sm:$0xff]  ;;  %v271_v63 = vld [vmem:[%s3807_s16 + $0x58] sm:$0xff] }
  0x31   : > { %3103 = vmatpush3.bf16.msra.mxu1 %v3535_v3  ;;  %1774 = vmatprep.mubr.bf16.mxu1 %v728_v17  ;;  %v302_v3 = vld [vmem:[%s3807_s16 + $0x150] sm:$0xff]  ;;  %v3569_v17 = vld [vmem:[%s4444_s2 + $0x218] sm:$0xff]   ;;  %v269_v55 = vld [vmem:[%s3807_s16 + $0x48] sm:$0xff] }
  0x32   : > { %3104 = vmatprep.subr.bf16.mxu1 %v3538_v6  ;;  %v3564_v6 = vld [vmem:[%s4444_s2 + $0x250] sm:$0xff]   ;;  %v3591_v7 = vld [vmem:[%s4444_s2 + $0x380] sm:$0xff]   ;;  %v3592_v8 = vld [vmem:[%s4444_s2 + $0x348] sm:$0xff]  }
  0x33   : > { %3065 = vmatpush3.bf16.msra.mxu0 %v3537_v5  ;;  %v710_v5 = vpack.c.bf16 %v321_v4, %v302_v3  ;;  %v290_v0 = vld [vmem:[%s3807_s16 + $0xf0] sm:$0xff]  ;;  %v289_v4 = vld [vmem:[%s3807_s16 + $0xe8] sm:$0xff] }
  0x34   : > { %3066 = vmatprep.subr.bf16.mxu0 %v3540_v14  ;;  %v3566_v14 = vld [vmem:[%s4444_s2 + $0x2d0] sm:$0xff]  }
  0x35   : > { %3105 = vmatpush3.bf16.msra.mxu1 %v3539_v10  ;;  %v3565_v10 = vld [vmem:[%s4444_s2 + $0x210] sm:$0xff]  }
  0x36   : > { %1711 = vmatmul.mubr.bf16.gmra.mrb[8].mxu0 %v725_v13  ;;  %3106 = vmatprep.subr.bf16.mxu1 %v3542_v22  ;;  %v712_v13 = vpack.c.bf16 %v323_v12, %v304_v11  ;;  %v3571_v22 = vld [vmem:[%s4444_s2 + $0x298] sm:$0xff]   ;;  %v270_v3 = vld [vmem:[%s3807_s16 + $0x50] sm:$0xff] }
  0x37   : > { %3067 = vmatpush3.bf16.msra.mxu0 %v3541_v18  ;;  %1718 = vmatprep.mubr.bf16.mxu0 %v745_v28  ;;  %v3570_v18 = vld [vmem:[%s4444_s2 + $0x2d8] sm:$0xff]   ;;  %v362_v28 = vld [vmem:[%s3807_s16 + $0x330] sm:$0xff] }
  0x38   : > { %1775 = vmatmul.mubr.bf16.gmra.mrb[8].mxu1 %v727_v21  ;;  %3068 = vmatprep.subr.bf16.mxu0 %v3544_v24  ;;  %v730_v21 = vpack.c.bf16 %v360_v20, %v341_v19  ;;  %v359_v24 = vld [vmem:[%s3807_s16 + $0x318] sm:$0xff]  ;;  %v326_v12 = vld [vmem:[%s3807_s16 + $0x210] sm:$0xff]  ;;  %v309_v19 = vld [vmem:[%s3807_s16 + $0x188] sm:$0xff] }
  0x39   : > { %3107 = vmatpush3.bf16.msra.mxu1 %v3543_v23  ;;  %1782 = vmatprep.mubr.bf16.mxu1 %v747_v34  ;;  %v340_v23 = vld [vmem:[%s3807_s16 + $0x280] sm:$0xff]  ;;  %v307_v11 = vld [vmem:[%s3807_s16 + $0x178] sm:$0xff] }
  0x3a   : > { %3108 = vmatprep.subr.bf16.mxu1 %v3546_v26  ;;  %v3572_v26 = vld [vmem:[%s4444_s2 + $0x260] sm:$0xff]  }
  0x3b   : > { %3069 = vmatpush3.bf16.msra.mxu0 %v3545_v25  ;;  %v729_v25 = vpack.c.bf16 %v359_v24, %v340_v23  ;;  %v3574_v34 = vld [vmem:[%s4444_s2 + $0x2e0] sm:$0xff]   ;;  %v327_v24 = vld [vmem:[%s3807_s16 + $0x218] sm:$0xff] }
  0x3c   : > { %3070 = vmatprep.subr.bf16.mxu0 %v3548_v32  ;;  %v361_v32 = vld [vmem:[%s3807_s16 + $0x328] sm:$0xff]  ;;  %v328_v20 = vld [vmem:[%s3807_s16 + $0x220] sm:$0xff] }
  0x3d   : > { %3109 = vmatpush3.bf16.msra.mxu1 %v3547_v29  ;;  %v732_v29 = vpack.c.bf16 %v362_v28, %v343_v27  ;;  %v308_v23 = vld [vmem:[%s3807_s16 + $0x180] sm:$0xff]  ;;  %v3599_v27 = vld [vmem:[%s4444_s2 + $0x390] sm:$0xff]   ;;  %v3600_v28 = vld [vmem:[%s4444_s2 + $0x358] sm:$0xff]  }
  0x3e   : > { %1719 = vmatmul.mubr.bf16.gmra.mrb[12].mxu0 %v744_v31  ;;  %3110 = vmatprep.subr.bf16.mxu1 %v3550_v38  ;;  %v342_v31 = vld [vmem:[%s3807_s16 + $0x290] sm:$0xff]  ;;  %v3578_v38 = vld [vmem:[%s4444_s2 + $0x2e8] sm:$0xff]  }
  0x3f   : > { %3071 = vmatpush3.bf16.msra.mxu0 %v3549_v35  ;;  %1822 = vmatprep.mubr.bf16.mxu0 %v692_v45  ;;  %v731_v33 = vpack.c.bf16 %v361_v32, %v342_v31  ;;  %v3575_v35 = vld [vmem:[%s4444_s2 + $0x2a0] sm:$0xff]   ;;  %v381_v45 = vld [vmem:[%s3807_s16 + $0x3c8] sm:$0xff] }
  0x40   : > { %1783 = vmatmul.mubr.bf16.gmra.mrb[12].mxu1 %v746_v37  ;;  %3072 = vmatprep.subr.bf16.mxu0 %v3552_v40  ;;  %v3577_v37 = vld [vmem:[%s4444_s2 + $0x228] sm:$0xff]   ;;  %v364_v32 = vld [vmem:[%s3807_s16 + $0x340] sm:$0xff] }
  0x41   : > { %3111 = vmatpush3.bf16.msra.mxu1 %v3551_v39  ;;  %1886 = vmatprep.mubr.bf16.mxu1 %v694_v53  ;;  %v379_v39 = vld [vmem:[%s3807_s16 + $0x3b8] sm:$0xff]  ;;  %v345_v31 = vld [vmem:[%s3807_s16 + $0x2a8] sm:$0xff] }
  0x42   : > { %3112 = vmatprep.subr.bf16.mxu1 %v3554_v42  ;;  %v749_v40 = vpack.c.bf16 %v379_v39, %v379_v39  ;;  %v378_v42 = vld [vmem:[%s3807_s16 + $0x3b0] sm:$0xff]  ;;  %v3585_v53 = vld [vmem:[%s4444_s2 + $0x238] sm:$0xff]  }
  0x43   : > { %3073 = vmatpush3.bf16.msra.mxu0 %v3553_v41  ;;  %v3579_v41 = vld [vmem:[%s4444_s2 + $0x2a8] sm:$0xff]   ;;  %v748_v43 = vpack.c.bf16 %v378_v42, %v378_v42  ;;  %v347_v39 = vld [vmem:[%s3807_s16 + $0x2b8] sm:$0xff]  ;;  %v3605_v42 = vld [vmem:[%s4444_s2 + $0x320] sm:$0xff]  }
  0x44   : > { %3138 = vmatprep.subr.bf16.mxu0 %v3556_v50  ;;  %v3582_v50 = vld [vmem:[%s4444_s2 + $0x2f0] sm:$0xff]  }
  0x45   : > { %3113 = vmatpush3.bf16.msra.mxu1 %v3555_v46  ;;  %v751_v46 = vpack.c.bf16 %v381_v45, %v381_v45 }
  0x46   : > { %1823 = vmatmul.mubr.bf16.vlgmr.msra.gmra.mrb[16].mxu0 %v691_v49  ;;  %3178 = vmatprep.subr.bf16.mxu1 %v3558_v58  ;;  %v750_v49 = vpack.c.bf16 %v380_v48, %v380_v48  ;;  %v3587_v58 = vld [vmem:[%s4444_s2 + $0x2b8] sm:$0xff]   ;;  %v3608_v48 = vld [vmem:[%s4444_s2 + $0x368] sm:$0xff]  }
  0x47   : > { %3139 = vmatpush3.bf16.msra.mxu0 %v3557_v54  ;;  %1830 = vmatprep.mubr.bf16.mxu0 %v711_v1  ;;  %v3586_v54 = vld [vmem:[%s4444_s2 + $0x2f8] sm:$0xff]   ;;  %v698_v1 = vpack.c.bf16 %v290_v0, %v271_v63  ;;  %v3615_v63 = vld [vmem:[%s4444_s2 + $0x3b0] sm:$0xff]  }
  0x48   : > { %1887 = vmatmul.mubr.bf16.vlgmr.msra.gmra.mrb[16].mxu1 %v693_v57  ;;  %3140 = vmatprep.subr.bf16.mxu0 %v3560_v60  ;;  %v696_v57 = vpack.c.bf16 %v288_v56, %v269_v55  ;;  %v287_v60 = vld [vmem:[%s3807_s16 + $0xd8] sm:$0xff]  ;;  %v3612_v56 = vld [vmem:[%s4444_s2 + $0x370] sm:$0xff]  }
  0x49   : > { %3179 = vmatpush3.bf16.msra.mxu1 %v3559_v59  ;;  %1894 = vmatprep.mubr.bf16.mxu1 %v713_v9  ;;  %v268_v59 = vld [vmem:[%s3807_s16 + $0x40] sm:$0xff]  ;;  %v3593_v9 = vld [vmem:[%s4444_s2 + $0x308] sm:$0xff]   ;;  %v3616_v0 = vld [vmem:[%s4444_s2 + $0x378] sm:$0xff]  }
  0x4a   : > { %3180 = vmatprep.subr.bf16.mxu1 %v3562_v62  ;;  %v3588_v62 = vld [vmem:[%s4444_s2 + $0x340] sm:$0xff]  }
  0x4b   : > { %3141 = vmatpush3.bf16.msra.mxu0 %v3561_v61  ;;  %v695_v61 = vpack.c.bf16 %v287_v60, %v268_v59  ;;  %v3613_v59 = vld [vmem:[%s4444_s2 + $0x330] sm:$0xff]   ;;  %v384_v60 = vld [vmem:[%s3807_s16 + $0x3e0] sm:$0xff] }
  0x4c   : > { %3142 = vmatprep.subr.bf16.mxu0 %v3564_v6  ;;  %v3590_v6 = vld [vmem:[%s4444_s2 + $0x3c0] sm:$0xff]  }
  0x4d   : > { %3181 = vmatpush3.bf16.msra.mxu1 %v3563_v2  ;;  %v3589_v2 = vld [vmem:[%s4444_s2 + $0x300] sm:$0xff]  }
  0x4e   : > { %1831 = vmatmul.mubr.bf16.gmra.mrb[20].mxu0 %v710_v5  ;;  %3182 = vmatprep.subr.bf16.mxu1 %v3566_v14  ;;  %v697_v5 = vpack.c.bf16 %v289_v4, %v270_v3  ;;  %v3595_v14 = vld [vmem:[%s4444_s2 + $0x388] sm:$0xff]   ;;  %v292_v4 = vld [vmem:[%s3807_s16 + $0x100] sm:$0xff] }
  0x4f   : > { %3143 = vmatpush3.bf16.msra.mxu0 %v3565_v10  ;;  %1838 = vmatprep.mubr.bf16.mxu0 %v730_v21  ;;  %v3594_v10 = vld [vmem:[%s4444_s2 + $0x3c8] sm:$0xff]   ;;  %v717_v21 = vpack.c.bf16 %v328_v20, %v309_v19  ;;  %v311_v20 = vld [vmem:[%s3807_s16 + $0x198] sm:$0xff] }
  0x50   : > { %1895 = vmatmul.mubr.bf16.gmra.mrb[20].mxu1 %v712_v13  ;;  %3144 = vmatprep.subr.bf16.mxu0 %v3568_v16  ;;  %v715_v13 = vpack.c.bf16 %v326_v12, %v307_v11  ;;  %v325_v16 = vld [vmem:[%s3807_s16 + $0x208] sm:$0xff]  ;;  %v275_v11 = vld [vmem:[%s3807_s16 + $0x78] sm:$0xff]  ;;  %v294_v12 = vld [vmem:[%s3807_s16 + $0x110] sm:$0xff] }
  0x51   : > { %3183 = vmatpush3.bf16.msra.mxu1 %v3567_v15  ;;  %1902 = vmatprep.mubr.bf16.mxu1 %v732_v29  ;;  %v306_v15 = vld [vmem:[%s3807_s16 + $0x170] sm:$0xff]  ;;  %v3601_v29 = vld [vmem:[%s4444_s2 + $0x318] sm:$0xff]   ;;  %v273_v3 = vld [vmem:[%s3807_s16 + $0x68] sm:$0xff] }
  0x52   : > { %3184 = vmatprep.subr.bf16.mxu1 %v3570_v18  ;;  %v3596_v18 = vld [vmem:[%s4444_s2 + $0x350] sm:$0xff]   ;;  %v3623_v19 = vld [vmem:[%s4444_s2 + $0x408] sm:$0xff]  }
  0x53   : > { %3145 = vmatpush3.bf16.msra.mxu0 %v3569_v17  ;;  %v714_v17 = vpack.c.bf16 %v325_v16, %v306_v15  ;;  %v274_v15 = vld [vmem:[%s3807_s16 + $0x70] sm:$0xff]  ;;  %v293_v16 = vld [vmem:[%s3807_s16 + $0x108] sm:$0xff] }
  0x54   : > { %3146 = vmatprep.subr.bf16.mxu0 %v3572_v26  ;;  %v3598_v26 = vld [vmem:[%s4444_s2 + $0x3d0] sm:$0xff]  }
  0x55   : > { %3185 = vmatpush3.bf16.msra.mxu1 %v3571_v22  ;;  %v3597_v22 = vld [vmem:[%s4444_s2 + $0x310] sm:$0xff]  }
  0x56   : > { %1839 = vmatmul.mubr.bf16.gmra.mrb[24].mxu0 %v729_v25  ;;  %3186 = vmatprep.subr.bf16.mxu1 %v3574_v34  ;;  %v716_v25 = vpack.c.bf16 %v327_v24, %v308_v23  ;;  %v3603_v34 = vld [vmem:[%s4444_s2 + $0x398] sm:$0xff]   ;;  %v329_v23 = vld [vmem:[%s3807_s16 + $0x228] sm:$0xff] }
  0x57   : > { %3147 = vmatpush3.bf16.msra.mxu0 %v3573_v30  ;;  %1846 = vmatprep.mubr.bf16.mxu0 %v749_v40  ;;  %v3602_v30 = vld [vmem:[%s4444_s2 + $0x3d8] sm:$0xff]   ;;  %v366_v40 = vld [vmem:[%s3807_s16 + $0x350] sm:$0xff] }
  0x58   : > { %1903 = vmatmul.mubr.bf16.gmra.mrb[24].mxu1 %v731_v33  ;;  %3148 = vmatprep.subr.bf16.mxu0 %v3576_v36  ;;  %v734_v33 = vpack.c.bf16 %v364_v32, %v345_v31  ;;  %v363_v36 = vld [vmem:[%s3807_s16 + $0x338] sm:$0xff]  ;;  %v312_v31 = vld [vmem:[%s3807_s16 + $0x1a0] sm:$0xff] }
  0x59   : > { %3187 = vmatpush3.bf16.msra.mxu1 %v3575_v35  ;;  %1910 = vmatprep.mubr.bf16.mxu1 %v751_v46  ;;  %v344_v35 = vld [vmem:[%s3807_s16 + $0x2a0] sm:$0xff]  ;;  %v331_v32 = vld [vmem:[%s3807_s16 + $0x238] sm:$0xff] }
  0x5a   : > { %3188 = vmatprep.subr.bf16.mxu1 %v3578_v38  ;;  %v3604_v38 = vld [vmem:[%s4444_s2 + $0x360] sm:$0xff]  }
  0x5b   : > { %3149 = vmatpush3.bf16.msra.mxu0 %v3577_v37  ;;  %v733_v37 = vpack.c.bf16 %v363_v36, %v344_v35  ;;  %v3606_v46 = vld [vmem:[%s4444_s2 + $0x3e0] sm:$0xff]   ;;  %v3627_v35 = vld [vmem:[%s4444_s2 + $0x418] sm:$0xff]   ;;  %v349_v36 = vld [vmem:[%s3807_s16 + $0x2c8] sm:$0xff] }
  0x5c   : > { %3150 = vmatprep.subr.bf16.mxu0 %v3580_v44  ;;  %v365_v44 = vld [vmem:[%s3807_s16 + $0x348] sm:$0xff] }
  0x5d   : > { %3189 = vmatpush3.bf16.msra.mxu1 %v3579_v41  ;;  %v736_v41 = vpack.c.bf16 %v366_v40, %v347_v39  ;;  %v348_v39 = vld [vmem:[%s3807_s16 + $0x2c0] sm:$0xff]  ;;  %v367_v40 = vld [vmem:[%s3807_s16 + $0x358] sm:$0xff] }
  0x5e   : > { %1847 = vmatmul.mubr.bf16.gmra.mrb[28].mxu0 %v748_v43  ;;  %3190 = vmatprep.subr.bf16.mxu1 %v3582_v50  ;;  %v346_v43 = vld [vmem:[%s3807_s16 + $0x2b0] sm:$0xff]  ;;  %v3610_v50 = vld [vmem:[%s4444_s2 + $0x3e8] sm:$0xff]  }
  0x5f   : > { %3151 = vmatpush3.bf16.msra.mxu0 %v3581_v47  ;;  %1950 = vmatprep.mubr.bf16.mxu0 %v696_v57  ;;  %v735_v45 = vpack.c.bf16 %v365_v44, %v346_v43  ;;  %v3607_v47 = vld [vmem:[%s4444_s2 + $0x3a0] sm:$0xff]   ;;  %v385_v57 = vld [vmem:[%s3807_s16 + $0x3e8] sm:$0xff]  ;;  %v737_v43 = vpack.c.bf16 %v367_v40, %v348_v39  ;;  %v370_v44 = vld [vmem:[%s3807_s16 + $0x370] sm:$0xff] }
  0x60   : > { %1911 = vmatmul.mubr.bf16.gmra.mrb[28].mxu1 %v750_v49  ;;  %3152 = vmatprep.subr.bf16.mxu0 %v3584_v52  ;;  %v3609_v49 = vld [vmem:[%s4444_s2 + $0x328] sm:$0xff]   ;;  %v4306_v39 = vld [vmem:[%s4443_s1] sm:$0xf] }
  0x61   : > { %3191 = vmatpush3.bf16.msra.mxu1 %v3583_v51  ;;  %2014 = vmatprep.mubr.bf16.mxu1 %v698_v1  ;;  %v383_v51 = vld [vmem:[%s3807_s16 + $0x3d8] sm:$0xff] }
  0x62   : > { %3192 = vmatprep.subr.bf16.mxu1 %v3586_v54  ;;  %v753_v52 = vpack.c.bf16 %v383_v51, %v383_v51  ;;  %v382_v54 = vld [vmem:[%s3807_s16 + $0x3d0] sm:$0xff]  ;;  %v3617_v1 = vld [vmem:[%s4444_s2 + $0x338] sm:$0xff]   ;;  %v3631_v51 = vld [vmem:[%s4444_s2 + $0x468] sm:$0xff]  }
  0x63   : > { %3153 = vmatpush3.bf16.msra.mxu0 %v3585_v53  ;;  %v3611_v53 = vld [vmem:[%s4444_s2 + $0x3a8] sm:$0xff]   ;;  %v752_v55 = vpack.c.bf16 %v382_v54, %v382_v54  ;;  %v386_v54 = vld [vmem:[%s3807_s16 + $0x3f0] sm:$0xff] }
  0x64   : > { %3218 = vmatprep.subr.bf16.mxu0 %v3588_v62  ;;  %v3614_v62 = vld [vmem:[%s4444_s2 + $0x3f0] sm:$0xff]  }
  0x65   : > { %3193 = vmatpush3.bf16.msra.mxu1 %v3587_v58  ;;  %v755_v58 = vpack.c.bf16 %v385_v57, %v385_v57  ;;  %v389_v57 = vld [vmem:[%s3807_s16 + $0x408] sm:$0xff] }
  0x66   : > { %1951 = vmatmul.mubr.bf16.vlgmr.msra.gmra.mrb[32].mxu0 %v695_v61  ;;  %3258 = vmatprep.subr.bf16.mxu1 %v3590_v6  ;;  %v754_v61 = vpack.c.bf16 %v384_v60, %v384_v60  ;;  %v3619_v6 = vld [vmem:[%s4444_s2 + $0x3b8] sm:$0xff]   ;;  %v756_v60 = vpack.c.bf16 %v386_v54, %v386_v54 }
  0x67   : > { %3219 = vmatpush3.bf16.msra.mxu0 %v3589_v2  ;;  %1958 = vmatprep.mubr.bf16.mxu0 %v715_v13  ;;  %v3618_v2 = vld [vmem:[%s4444_s2 + $0x3f8] sm:$0xff]   ;;  %v702_v13 = vpack.c.bf16 %v294_v12, %v275_v11  ;;  %v334_v12 = vld [vmem:[%s3807_s16 + $0x250] sm:$0xff] }
  0x68   : > { %2015 = vmatmul.mubr.bf16.vlgmr.msra.gmra.mrb[32].mxu1 %v697_v5  ;;  %3220 = vmatprep.subr.bf16.mxu0 %v3592_v8  ;;  %v700_v5 = vpack.c.bf16 %v292_v4, %v273_v3  ;;  %v291_v8 = vld [vmem:[%s3807_s16 + $0xf8] sm:$0xff]  ;;  %v296_v3 = vld [vmem:[%s3807_s16 + $0x120] sm:$0xff] }
  0x69   : > { %3259 = vmatpush3.bf16.msra.mxu1 %v3591_v7  ;;  %2022 = vmatprep.mubr.bf16.mxu1 %v717_v21  ;;  %v272_v7 = vld [vmem:[%s3807_s16 + $0x60] sm:$0xff]  ;;  %v330_v21 = vld [vmem:[%s3807_s16 + $0x230] sm:$0xff]  ;;  %v315_v11 = vld [vmem:[%s3807_s16 + $0x1b8] sm:$0xff] }
  0x6a   : > { %3260 = vmatprep.subr.bf16.mxu1 %v3594_v10  ;;  %v3620_v10 = vld [vmem:[%s4444_s2 + $0x440] sm:$0xff]   ;;  %v719_v24 = vpack.c.bf16 %v330_v21, %v311_v20  ;;  %v314_v20 = vld [vmem:[%s3807_s16 + $0x1b0] sm:$0xff]  ;;  %v333_v21 = vld [vmem:[%s3807_s16 + $0x248] sm:$0xff] }
  0x6b   : > { %3221 = vmatpush3.bf16.msra.mxu0 %v3593_v9  ;;  %v699_v9 = vpack.c.bf16 %v291_v8, %v272_v7  ;;  %v3638_v7 = vld [vmem:[%s4444_s2 + $0x490] sm:$0xff]  }
  0x6c   : > { %3222 = vmatprep.subr.bf16.mxu0 %v3596_v18  ;;  %v3622_v18 = vld [vmem:[%s4444_s2 + $0x448] sm:$0xff]   ;;  %v278_v8 = vld [vmem:[%s3807_s16 + $0x90] sm:$0xff] }
  0x6d   : > { %3261 = vmatpush3.bf16.msra.mxu1 %v3595_v14  ;;  %v3621_v14 = vld [vmem:[%s4444_s2 + $0x400] sm:$0xff]  }
  0x6e   : > { %1959 = vmatmul.mubr.bf16.gmra.mrb[36].mxu0 %v714_v17  ;;  %3262 = vmatprep.subr.bf16.mxu1 %v3598_v26  ;;  %v701_v17 = vpack.c.bf16 %v293_v16, %v274_v15  ;;  %v3624_v26 = vld [vmem:[%s4444_s2 + $0x450] sm:$0xff]   ;;  %v335_v15 = vld [vmem:[%s3807_s16 + $0x258] sm:$0xff]  ;;  %v723_v16 = vpack.c.bf16 %v334_v12, %v315_v11  ;;  %v3640_v11 = vld [vmem:[%s4445_s3 + $0x8] sm:$0xff]  }
  0x6f   : > { %3223 = vmatpush3.bf16.msra.mxu0 %v3597_v22  ;;  %1966 = vmatprep.mubr.bf16.mxu0 %v734_v33  ;;  %v310_v22 = vld [vmem:[%s3807_s16 + $0x190] sm:$0xff]  ;;  %v720_v33 = vpack.c.bf16 %v331_v32, %v312_v31  ;;  %v391_v31 = vld [vmem:[%s3807_s16 + $0x418] sm:$0xff] }
  0x70   : > { %2023 = vmatmul.mubr.bf16.gmra.mrb[36].mxu1 %v716_v25  ;;  %3224 = vmatprep.subr.bf16.mxu0 %v3600_v28  ;;  %v718_v25 = vpack.c.bf16 %v329_v23, %v310_v22  ;;  %v332_v28 = vld [vmem:[%s3807_s16 + $0x240] sm:$0xff]  ;;  %v353_v22 = vld [vmem:[%s3807_s16 + $0x2e8] sm:$0xff] }
  0x71   : > { %3263 = vmatpush3.bf16.msra.mxu1 %v3599_v27  ;;  %2030 = vmatprep.mubr.bf16.mxu1 %v736_v41  ;;  %v313_v27 = vld [vmem:[%s3807_s16 + $0x1a8] sm:$0xff]  ;;  %v3628_v41 = vld [vmem:[%s4444_s2 + $0x460] sm:$0xff]  }
  0x72   : > { %3264 = vmatprep.subr.bf16.mxu1 %v3602_v30  ;;  %v3625_v30 = vld [vmem:[%s4444_s2 + $0x410] sm:$0xff]   ;;  %v372_v23 = vld [vmem:[%s3807_s16 + $0x380] sm:$0xff] }
  0x73   : > { %3225 = vmatpush3.bf16.msra.mxu0 %v3601_v29  ;;  %v721_v29 = vpack.c.bf16 %v332_v28, %v313_v27  ;;  %v742_v27 = vpack.c.bf16 %v372_v23, %v353_v22  ;;  %v352_v28 = vld [vmem:[%s3807_s16 + $0x2e0] sm:$0xff] }
  0x74   : > { %3226 = vmatprep.subr.bf16.mxu0 %v3604_v38 }
  0x75   : > { %3265 = vmatpush3.bf16.msra.mxu1 %v3603_v34  ;;  %v3626_v34 = vld [vmem:[%s4444_s2 + $0x458] sm:$0xff]  }
  0x76   : > { %1967 = vmatmul.mubr.bf16.gmra.mrb[40].mxu0 %v733_v37  ;;  %3266 = vmatprep.subr.bf16.mxu1 %v3606_v46  ;;  %v368_v37 = vld [vmem:[%s3807_s16 + $0x360] sm:$0xff] }
  0x77   : > { %3227 = vmatpush3.bf16.msra.mxu0 %v3605_v42  ;;  %1974 = vmatprep.mubr.bf16.mxu0 %v753_v52  ;;  %v738_v38 = vpack.c.bf16 %v368_v37, %v349_v36  ;;  %v351_v42 = vld [vmem:[%s3807_s16 + $0x2d8] sm:$0xff]  ;;  %v3629_v46 = vld [vmem:[%s4444_s2 + $0x420] sm:$0xff]   ;;  %v3632_v52 = vld [vmem:[%s4444_s2 + $0x428] sm:$0xff]   ;;  %v763_v36 = vlaneseq }
  0x78   : > { %2031 = vmatmul.mubr.bf16.gmra.mrb[40].mxu1 %v735_v45  ;;  %3228 = vmatprep.subr.bf16.mxu0 %v3608_v48  ;;  %v740_v45 = vpack.c.bf16 %v370_v44, %v351_v42  ;;  %v350_v48 = vld [vmem:[%s3807_s16 + $0x2d0] sm:$0xff] }
  0x79   : > { %3267 = vmatpush3.bf16.msra.mxu1 %v3607_v47  ;;  %2038 = vmatprep.mubr.bf16.mxu1 %v755_v58  ;;  %v3630_v47 = vld [vmem:[%s4444_s2 + $0x480] sm:$0xff]   ;;  %v759_v58 = vpack.c.bf16 %v389_v57, %v389_v57  ;;  %v4300_v37 = vshrl.u32 %v763_v36, 7 }
  0x7a   : > { %3268 = vmatprep.subr.bf16.mxu1 %v3610_v50 }
  0x7b   : > { %3229 = vmatpush3.bf16.msra.mxu0 %v3609_v49  ;;  %v369_v49 = vld [vmem:[%s3807_s16 + $0x368] sm:$0xff] }
  0x7c   : > { %3230 = vmatprep.subr.bf16.mxu0 %v3612_v56  ;;  %v739_v50 = vpack.c.bf16 %v369_v49, %v350_v48  ;;  %v3633_v56 = vld [vmem:[%s4444_s2 + $0x470] sm:$0xff]  }
  0x7d   : > { %3269 = vmatpush3.bf16.msra.mxu1 %v3611_v53  ;;  %v387_v53 = vld [vmem:[%s3807_s16 + $0x3f8] sm:$0xff] }
  0x7e   : > { %1975 = vmatmul.mubr.bf16.gmra.mrb[44].mxu0 %v752_v55  ;;  %3270 = vmatprep.subr.bf16.mxu1 %v3614_v62  ;;  %v757_v55 = vpack.c.bf16 %v387_v53, %v387_v53  ;;  %v3635_v62 = vld [vmem:[%s4444_s2 + $0x478] sm:$0xff]  }
  0x7f   : > { %3231 = vmatpush3.bf16.msra.mxu0 %v3613_v59  ;;  %2078 = vmatprep.mubr.bf16.mxu0 %v700_v5  ;;  %v3634_v59 = vld [vmem:[%s4444_s2 + $0x430] sm:$0xff]   ;;  %v276_v5 = vld [vmem:[%s3807_s16 + $0x80] sm:$0xff] }
  0x80   : > { %2039 = vmatmul.mubr.bf16.gmra.mrb[44].mxu1 %v754_v61  ;;  %3232 = vmatprep.subr.bf16.mxu0 %v3616_v0  ;;  %v388_v61 = vld [vmem:[%s3807_s16 + $0x400] sm:$0xff] }
  0x81   : > { %3271 = vmatpush3.bf16.msra.mxu1 %v3615_v63  ;;  %2142 = vmatprep.mubr.bf16.mxu1 %v702_v13  ;;  %v3636_v63 = vld [vmem:[%s4444_s2 + $0x488] sm:$0xff]   ;;  %v758_v0 = vpack.c.bf16 %v388_v61, %v388_v61 }
  0x82   : > { %3272 = vmatprep.subr.bf16.mxu1 %v3618_v2  ;;  %v277_v2 = vld [vmem:[%s3807_s16 + $0x88] sm:$0xff] }
  0x83   : > { %3233 = vmatpush3.bf16.msra.mxu0 %v3617_v1  ;;  %v3637_v1 = vld [vmem:[%s4444_s2 + $0x438] sm:$0xff]   ;;  %v704_v4 = vpack.c.bf16 %v296_v3, %v277_v2 }
  0x84   : > { %3298 = vmatprep.subr.bf16.mxu0 %v3620_v10 }
  0x85   : > { %3273 = vmatpush3.bf16.msra.mxu1 %v3619_v6  ;;  %v295_v6 = vld [vmem:[%s3807_s16 + $0x118] sm:$0xff] }
  0x86   : > { %2079 = vmatmul.mubr.bf16.vlgmr.msra.gmra.mrb[48].mxu0 %v699_v9  ;;  %3381 = vmatprep.subr.bf16.mxu1 %v3630_v47  ;;  %v297_v9 = vld [vmem:[%s3807_s16 + $0x128] sm:$0xff]  ;;  %v703_v13 = vpack.c.bf16 %v295_v6, %v276_v5  ;;  %v3639_v6 = vld [vmem:[%s4445_s3] sm:$0xff]  }
  0x87   : > { %3299 = vmatpush3.bf16.msra.mxu0 %v3621_v14  ;;  %2086 = vmatprep.mubr.bf16.mxu0 %v719_v24  ;;  %v705_v10 = vpack.c.bf16 %v297_v9, %v278_v8  ;;  %v316_v14 = vld [vmem:[%s3807_s16 + $0x1c0] sm:$0xff] }
  0x88   : > { %2143 = vmatmul.mubr.bf16.vlgmr.msra.gmra.mrb[48].mxu1 %v701_v17  ;;  %3300 = vmatprep.subr.bf16.mxu0 %v3622_v18  ;;  %v354_v17 = vld [vmem:[%s3807_s16 + $0x2f0] sm:$0xff]  ;;  %v373_v18 = vld [vmem:[%s3807_s16 + $0x388] sm:$0xff] }
  0x89   : > { %2150 = vmatprep.mubr.bf16.mxu1 %v721_v29  ;;  %3382 = vmatpush3.bf16.msra.mxu1 %v3630_v47  ;;  %v743_v24 = vpack.c.bf16 %v373_v18, %v354_v17  ;;  %v371_v29 = vld [vmem:[%s3807_s16 + $0x378] sm:$0xff] }
  0x8a   : > { %3383 = vmatprep.subr.bf16.mxu1 %v3636_v63  ;;  %v741_v32 = vpack.c.bf16 %v371_v29, %v352_v28 }
  0x8b   : > { %3301 = vmatpush3.bf16.msra.mxu0 %v3623_v19  ;;  %v724_v19 = vpack.c.bf16 %v335_v15, %v316_v14 }
  0x8c   : > { %3302 = vmatprep.subr.bf16.mxu0 %v3624_v26  ;;  %v722_v26 = vpack.c.bf16 %v333_v21, %v314_v20  ;;  %v3641_v20 = vld [vmem:[%s4445_s3 + $0x10] sm:$0xff]  }
  0x8d   : > { %3384 = vmatpush3.bf16.msra.mxu1 %v3636_v63 }
  0x8e   : > { %2087 = vmatmul.mubr.bf16.gmra.mrb[52].mxu0 %v718_v25  ;;  %3385 = vmatprep.subr.bf16.mxu1 %v3638_v7  ;;  %v392_v25 = vld [vmem:[%s3807_s16 + $0x420] sm:$0xff] }
  0x8f   : > { %3303 = vmatpush3.bf16.msra.mxu0 %v3625_v30  ;;  %2094 = vmatprep.mubr.bf16.mxu0 %v738_v38  ;;  %v762_v30 = vpack.c.bf16 %v392_v25, %v392_v25  ;;  %v765_v38 = vsub.s32 0, %v4300_v37 }
  0x90   : > { %3304 = vmatprep.subr.bf16.mxu0 %v3626_v34  ;;  %2151 = vmatmul.mubr.bf16.gmra.mrb[52].mxu1 %v720_v33  ;;  %v761_v33 = vpack.c.bf16 %v391_v31, %v391_v31  ;;  %v390_v34 = vld [vmem:[%s3807_s16 + $0x410] sm:$0xff] }
  0x91   : > { %2158 = vmatprep.mubr.bf16.mxu1 %v740_v45  ;;  %3386 = vmatpush3.bf16.msra.mxu1 %v3638_v7 }
  0x93   : > { %3305 = vmatpush3.bf16.msra.mxu0 %v3627_v35  ;;  %v760_v35 = vpack.c.bf16 %v390_v34, %v390_v34 }
  0x94   : > { %3306 = vmatprep.subr.bf16.mxu0 %v3628_v41  ;;  %v4309_v41 = vrot.slane %v4306_v39, %v765_v38 }
  0x96   : > { %2095 = vmatmul.mubr.bf16.gmra.mrb[56].mxu0 %v737_v43 }
  0x97   : > { %3307 = vmatpush3.bf16.msra.mxu0 %v3629_v46  ;;  %2102 = vmatprep.mubr.bf16.mxu0 %v757_v55 }
  0x98   : > { %3308 = vmatprep.subr.bf16.mxu0 %v3631_v51  ;;  %2159 = vmatmul.mubr.bf16.gmra.mrb[56].mxu1 %v739_v50 }
  0x99   : > { %2166 = vmatprep.mubr.bf16.mxu1 %v759_v58 }
  0x9b   : > { %3309 = vmatpush3.bf16.msra.mxu0 %v3632_v52 }
  0x9c   : > { %3310 = vmatprep.subr.bf16.mxu0 %v3633_v56 }
  0x9e   : > { %2103 = vmatmul.mubr.bf16.gmra.mrb[60].mxu0 %v756_v60 }
  0x9f   : > { %3311 = vmatpush3.bf16.msra.mxu0 %v3634_v59  ;;  %2206 = vmatprep.mubr.bf16.mxu0 %v704_v4 }
  0xa0   : > { %3312 = vmatprep.subr.bf16.mxu0 %v3635_v62  ;;  %2167 = vmatmul.mubr.bf16.gmra.mrb[60].mxu1 %v758_v0 }
  0xa1   : > { %3387 = vmatprep.mubr.msk.bf16.mxu1 %vm1649_vm0, %v705_v10 }
  0xa3   : > { %3313 = vmatpush3.bf16.msra.mxu0 %v3637_v1 }
  0xa4   : > { %3395 = vmatprep.subr.bf16.mxu0 %v3639_v6 }
  0xa6   : > { %2207 = vmatmul.mubr.bf16.vlgmr.msra.gmra.mrb[64].mxu0 %v703_v13 }
  0xa7   : > { %2214 = vmatprep.mubr.bf16.mxu0 %v723_v16  ;;  %3396 = vmatpush3.bf16.msra.mxu0 %v3639_v6 }
  0xa8   : > { %3388 = vmatmul.mubr.msk.bf16.vlgmr.msra.gmra.mrb[64].mxu1 %vm1649_vm0, %v724_v19  ;;  %3397 = vmatprep.subr.bf16.mxu0 %v3640_v11 }
  0xa9   : > { %3391 = vmatprep.mubr.msk.bf16.mxu1 %vm1649_vm0, %v743_v24 }
  0xab   : > { %3398 = vmatpush3.bf16.msra.mxu0 %v3640_v11 }
  0xac   : > { %3399 = vmatprep.subr.bf16.mxu0 %v3641_v20 }
  0xae   : > { %2215 = vmatmul.mubr.bf16.gmra.mrb[68].mxu0 %v722_v26 }
  0xaf   : > { %2222 = vmatprep.mubr.bf16.mxu0 %v742_v27  ;;  %3400 = vmatpush3.bf16.msra.mxu0 %v3641_v20  ;;  %v3642_v27 = vld [vmem:[%s4445_s3 + $0x18] sm:$0xff]  }
  0xb0   : > { %3392 = vmatmul.mubr.msk.bf16.gmra.mrb[68].mxu1 %vm1649_vm0, %v762_v30  ;;  %3401 = vmatprep.subr.bf16.mxu0 %v3642_v27 }
  0xb3   : > { %3402 = vmatpush3.bf16.msra.mxu0 %v3642_v27 }
  0xb6   : > { %2223 = vmatmul.mubr.bf16.gmra.mrb[72].mxu0 %v741_v32 }
  0xb7   : > { %2230 = vmatprep.mubr.bf16.mxu0 %v761_v33  ;;  %v3643_v33 = vld [vmem:[%s4445_s3 + $0x20] sm:$0xff]  }
  0xb8   : > { %3403 = vmatprep.subr.bf16.mxu0 %v3643_v33 }
  0xb9   : > { %3404 = vmatpush3.bf16.msra.mxu0 %v3643_v33 }
  0xbe   : > { %2231 = vmatmul.mubr.bf16.gmra.mrb[76].mxu0 %v760_v35 }
  0xf9   : > { %v2994_v40 = vpop.f32.mrb[0].mxu0 }
  0xfa   : > { %v2995_v42 = vpop.f32.mrb[1].mxu0 }
  0xfb   : > { %v2996_v43 = vadd.f32 %v2995_v42, %v2994_v40  ;;  %v2997_v44 = vpop.f32.mrb[2].mxu0  ;;  %v3034_v45 = vpop.f32.mrb[0].mxu1 }
  0xfc   : > { %v2998_v46 = vpop.f32.mrb[3].mxu0  ;;  %v3035_v49 = vpop.f32.mrb[1].mxu1 }
  0xfd   : > { %v1697_v47 = vadd.f32 %v2996_v43, %v4309_v41  ;;  %v2999_v48 = vadd.f32 %v2998_v46, %v2997_v44  ;;  %v3036_v50 = vadd.f32 %v3035_v49, %v3034_v45  ;;  %v3037_v51 = vpop.f32.mrb[2].mxu1  ;;  %v3644_v44 = vld [vmem:[%s4445_s3 + $0x28] sm:$0xff]  }
  0xfe   : > { %v3038_v53 = vpop.f32.mrb[3].mxu1  ;;  %3405 = vmatprep.subr.bf16.mxu0 %v3644_v44 }
  0xff   : > { %v1700_v52 = vadd.f32 %v2999_v48, %v4309_v41  ;;  %v4313_v54 = vadd.f32 %v3036_v50, %v1697_v47  ;;  %v3039_v55 = vadd.f32 %v3038_v53, %v3037_v51  ;;  %3406 = vmatpush3.bf16.msra.mxu0 %v3644_v44  ;;  %v3645_v47 = vld [vmem:[%s4445_s3 + $0x30] sm:$0xff]  }
 0x100   : > { %3407 = vmatprep.subr.bf16.mxu0 %v3645_v47 }
 0x101   : > { %v4315_v56 = vadd.f32 %v3039_v55, %v1700_v52  ;;  %v3000_v57 = vpop.f32.mrb[4].mxu0 }
 0x102   : > { %v3001_v58 = vpop.f32.mrb[5].mxu0 }
 0x103   : > { %v3002_v59 = vadd.f32 %v3001_v58, %v3000_v57  ;;  %v3003_v60 = vpop.f32.mrb[6].mxu0  ;;  %v3040_v63 = vpop.f32.mrb[4].mxu1  ;;  %3408 = vmatpush3.bf16.msra.mxu0 %v3645_v47  ;;  %v3646_v57 = vld [vmem:[%s4445_s3 + $0x38] sm:$0xff]   ;;  %v3651_v47 = vld [vmem:[%s4446_s4 + $0x20] sm:$0xff]  }
 0x104   : > { %v3004_v61 = vpop.f32.mrb[7].mxu0  ;;  %v3041_v1 = vpop.f32.mrb[5].mxu1  ;;  %3409 = vmatprep.subr.bf16.mxu0 %v3646_v57 }
 0x105   : > { %v1705_v62 = vadd.f32 %v3002_v59, %v4309_v41  ;;  %v3005_v0 = vadd.f32 %v3004_v61, %v3003_v60  ;;  %v3042_v3 = vadd.f32 %v3041_v1, %v3040_v63  ;;  %v3043_v4 = vpop.f32.mrb[6].mxu1 }
 0x106   : > { %v3044_v5 = vpop.f32.mrb[7].mxu1 }
 0x107   : > { %v1708_v2 = vadd.f32 %v3005_v0, %v4309_v41  ;;  %v4322_v7 = vadd.f32 %v3042_v3, %v1705_v62  ;;  %v3045_v8 = vadd.f32 %v3044_v5, %v3043_v4  ;;  %3410 = vmatpush3.bf16.msra.mxu0 %v3646_v57 }
 0x109   : > { %v4324_v9 = vadd.f32 %v3045_v8, %v1708_v2  ;;  %v3006_v10 = vpop.f32.mrb[8].mxu0 }
 0x10a   : > { %v3007_v12 = vpop.f32.mrb[9].mxu0 }
 0x10b   : > { %v3008_v13 = vadd.f32 %v3007_v12, %v3006_v10  ;;  %v3009_v14 = vpop.f32.mrb[10].mxu0  ;;  %v3046_v15 = vpop.f32.mrb[8].mxu1 }
 0x10c   : > { %v3010_v16 = vpop.f32.mrb[11].mxu0  ;;  %v3047_v19 = vpop.f32.mrb[9].mxu1 }
 0x10d   : > { %v1713_v17 = vadd.f32 %v3008_v13, %v4309_v41  ;;  %v3011_v18 = vadd.f32 %v3010_v16, %v3009_v14  ;;  %v3048_v21 = vadd.f32 %v3047_v19, %v3046_v15  ;;  %v3049_v22 = vpop.f32.mrb[10].mxu1 }
 0x10e   : > { %v3050_v24 = vpop.f32.mrb[11].mxu1 }
 0x10f   : > { %v1716_v23 = vadd.f32 %v3011_v18, %v4309_v41  ;;  %v4334_v25 = vadd.f32 %v3048_v21, %v1713_v17  ;;  %v3051_v26 = vadd.f32 %v3050_v24, %v3049_v22  ;;  %v3648_v21 = vld [vmem:[%s4446_s4 + $0x8] sm:$0xff]  }
 0x111   : > { %v4339_v28 = vadd.f32 %v3051_v26, %v1716_v23  ;;  %v3012_v29 = vpop.f32.mrb[12].mxu0 }
 0x112   : > { %v3013_v30 = vpop.f32.mrb[13].mxu0 }
 0x113   : > { %v3014_v31 = vadd.f32 %v3013_v30, %v3012_v29  ;;  %v3015_v32 = vpop.f32.mrb[14].mxu0  ;;  %v3052_v34 = vpop.f32.mrb[12].mxu1 }
 0x114   : > { %v3016_v35 = vpop.f32.mrb[15].mxu0  ;;  %v3053_v38 = vpop.f32.mrb[13].mxu1 }
 0x115   : > { %v1721_v36 = vadd.f32 %v3014_v31, %v4309_v41  ;;  %v3054_v40 = vadd.f32 %v3053_v38, %v3052_v34  ;;  %v3055_v42 = vpop.f32.mrb[14].mxu1  ;;  %v3649_v31 = vld [vmem:[%s4446_s4 + $0x10] sm:$0xff]  }
 0x116   : > { %v3056_v43 = vpop.f32.mrb[15].mxu1 }
 0x117   : > { %v4348_v45 = vadd.f32 %v3054_v40, %v1721_v36 }
 0x119   : > { %v3074_v46 = vpop.f32.mrb[16].mxu0 }
 0x11a   : > { %v3075_v41 = vpop.f32.mrb[17].mxu0 }
 0x11b   : > { %v3076_v48 = vadd.f32 %v3075_v41, %v3074_v46  ;;  %v3077_v49 = vpop.f32.mrb[18].mxu0  ;;  %v3114_v50 = vpop.f32.mrb[16].mxu1 }
 0x11c   : > { %v3078_v51 = vpop.f32.mrb[19].mxu0  ;;  %v3115_v55 = vpop.f32.mrb[17].mxu1 }
 0x11d   : > { %v1825_v52 = vadd.f32 %v3076_v48, %v4313_v54  ;;  %v3079_v53 = vadd.f32 %v3078_v51, %v3077_v49  ;;  %v3116_v58 = vadd.f32 %v3115_v55, %v3114_v50  ;;  %v3117_v59 = vpop.f32.mrb[18].mxu1  ;;  %v3652_v51 = vld [vmem:[%s4446_s4 + $0x28] sm:$0xff]  }
 0x11e   : > { %v3118_v61 = vpop.f32.mrb[19].mxu1 }
 0x11f   : > { %v1828_v60 = vadd.f32 %v3079_v53, %v4315_v56  ;;  %v4358_v62 = vadd.f32 %v3116_v58, %v1825_v52  ;;  %v3119_v63 = vadd.f32 %v3118_v61, %v3117_v59 }
 0x121   : > { %v4360_v0 = vadd.f32 %v3119_v63, %v1828_v60  ;;  %v3080_v1 = vpop.f32.mrb[20].mxu0 }
 0x122   : > { %v3081_v54 = vpop.f32.mrb[21].mxu0 }
 0x123   : > { %v3082_v2 = vadd.f32 %v3081_v54, %v3080_v1  ;;  %v3083_v3 = vpop.f32.mrb[22].mxu0  ;;  %v3120_v4 = vpop.f32.mrb[20].mxu1 }
 0x124   : > { %v3084_v5 = vpop.f32.mrb[23].mxu0  ;;  %v3121_v10 = vpop.f32.mrb[21].mxu1 }
 0x125   : > { %v1833_v6 = vadd.f32 %v3082_v2, %v4322_v7  ;;  %v3085_v8 = vadd.f32 %v3084_v5, %v3083_v3  ;;  %v3122_v11 = vadd.f32 %v3121_v10, %v3120_v4  ;;  %v3123_v56 = vpop.f32.mrb[22].mxu1  ;;  %v3647_v7 = vld [vmem:[%s4446_s4] sm:$0xff]  }
 0x126   : > { %v3124_v13 = vpop.f32.mrb[23].mxu1  ;;  %3419 = vmatprep.subr.bf16.mxu1 %v3647_v7 }
 0x127   : > { %v1836_v12 = vadd.f32 %v3085_v8, %v4324_v9  ;;  %v4364_v14 = vadd.f32 %v3122_v11, %v1833_v6  ;;  %v3125_v15 = vadd.f32 %v3124_v13, %v3123_v56  ;;  %3420 = vmatpush3.bf16.msra.mxu1 %v3647_v7 }
 0x128   : > { %3421 = vmatprep.subr.bf16.mxu1 %v3648_v21 }
 0x129   : > { %v4366_v16 = vadd.f32 %v3125_v15, %v1836_v12  ;;  %v3086_v17 = vpop.f32.mrb[24].mxu0 }
 0x12a   : > { %v3087_v18 = vpop.f32.mrb[25].mxu0 }
 0x12b   : > { %v3088_v19 = vadd.f32 %v3087_v18, %v3086_v17  ;;  %v3089_v20 = vpop.f32.mrb[26].mxu0  ;;  %v3126_v23 = vpop.f32.mrb[24].mxu1  ;;  %3422 = vmatpush3.bf16.msra.mxu1 %v3648_v21 }
 0x12c   : > { %v3090_v22 = vpop.f32.mrb[27].mxu0  ;;  %v3127_v26 = vpop.f32.mrb[25].mxu1  ;;  %3423 = vmatprep.subr.bf16.mxu1 %v3649_v31 }
 0x12d   : > { %v1841_v9 = vadd.f32 %v3088_v19, %v4334_v25  ;;  %v3091_v24 = vadd.f32 %v3090_v22, %v3089_v20  ;;  %v3128_v29 = vadd.f32 %v3127_v26, %v3126_v23  ;;  %v3129_v30 = vpop.f32.mrb[26].mxu1 }
 0x12e   : > { %v3130_v32 = vpop.f32.mrb[27].mxu1 }
 0x12f   : > { %v1844_v27 = vadd.f32 %v3091_v24, %v4339_v28  ;;  %v4379_v33 = vadd.f32 %v3128_v29, %v1841_v9  ;;  %v3131_v34 = vadd.f32 %v3130_v32, %v3129_v30  ;;  %v3650_v28 = vld [vmem:[%s4446_s4 + $0x18] sm:$0xff]   ;;  %3424 = vmatpush3.bf16.msra.mxu1 %v3649_v31 }
 0x130   : > { %3425 = vmatprep.subr.bf16.mxu1 %v3650_v28 }
 0x131   : > { %v4381_v25 = vadd.f32 %v3131_v34, %v1844_v27  ;;  %v3092_v35 = vpop.f32.mrb[28].mxu0 }
 0x132   : > { %v3093_v36 = vpop.f32.mrb[29].mxu0 }
 0x133   : > { %v3094_v38 = vadd.f32 %v3093_v36, %v3092_v35  ;;  %v3095_v40 = vpop.f32.mrb[30].mxu0  ;;  %v3132_v42 = vpop.f32.mrb[28].mxu1  ;;  %3426 = vmatpush3.bf16.msra.mxu1 %v3650_v28 }
 0x134   : > { %v3096_v43 = vpop.f32.mrb[31].mxu0  ;;  %v3133_v46 = vpop.f32.mrb[29].mxu1  ;;  %3427 = vmatprep.subr.bf16.mxu1 %v3651_v47 }
 0x135   : > { %v1849_v44 = vadd.f32 %v3094_v38, %v4348_v45  ;;  %v3134_v41 = vadd.f32 %v3133_v46, %v3132_v42  ;;  %v3135_v48 = vpop.f32.mrb[30].mxu1 }
 0x136   : > { %v3136_v49 = vpop.f32.mrb[31].mxu1 }
 0x137   : > { %v1913_v50 = vadd.f32 %v3134_v41, %v1849_v44  ;;  %3428 = vmatpush3.bf16.msra.mxu1 %v3651_v47 }
 0x138   : > { %3429 = vmatprep.subr.bf16.mxu1 %v3652_v51 }
 0x139   : > { %v3154_v52 = vpop.f32.mrb[32].mxu0 }
 0x13a   : > { %v3155_v53 = vpop.f32.mrb[33].mxu0 }
 0x13b   : > { %v3156_v45 = vadd.f32 %v3155_v53, %v3154_v52  ;;  %v3157_v55 = vpop.f32.mrb[34].mxu0  ;;  %v3194_v59 = vpop.f32.mrb[32].mxu1  ;;  %3430 = vmatpush3.bf16.msra.mxu1 %v3652_v51 }
 0x13c   : > { %v3158_v57 = vpop.f32.mrb[35].mxu0  ;;  %v3195_v61 = vpop.f32.mrb[33].mxu1 }
 0x13d   : > { %v1953_v58 = vadd.f32 %v3156_v45, %v4358_v62  ;;  %v3159_v60 = vadd.f32 %v3158_v57, %v3157_v55  ;;  %v3196_v1 = vadd.f32 %v3195_v61, %v3194_v59  ;;  %v3197_v54 = vpop.f32.mrb[34].mxu1 }
 0x13e   : > { %v3198_v2 = vpop.f32.mrb[35].mxu1 }
 0x13f   : > { %v1956_v63 = vadd.f32 %v3159_v60, %v4360_v0  ;;  %v2017_v3 = vadd.f32 %v3196_v1, %v1953_v58  ;;  %v3199_v4 = vadd.f32 %v3198_v2, %v3197_v54 }
 0x141   : > { %v2020_v5 = vadd.f32 %v3199_v4, %v1956_v63  ;;  %v3160_v6 = vpop.f32.mrb[36].mxu0 }
 0x142   : > { %v3161_v8 = vpop.f32.mrb[37].mxu0 }
 0x143   : > { %v3162_v10 = vadd.f32 %v3161_v8, %v3160_v6  ;;  %v3163_v11 = vpop.f32.mrb[38].mxu0  ;;  %v3200_v56 = vpop.f32.mrb[36].mxu1 }
 0x144   : > { %v3164_v12 = vpop.f32.mrb[39].mxu0  ;;  %v3201_v15 = vpop.f32.mrb[37].mxu1 }
 0x145   : > { %v1961_v62 = vadd.f32 %v3162_v10, %v4364_v14  ;;  %v3165_v13 = vadd.f32 %v3164_v12, %v3163_v11  ;;  %v3202_v17 = vadd.f32 %v3201_v15, %v3200_v56  ;;  %v3203_v18 = vpop.f32.mrb[38].mxu1 }
 0x146   : > { %v3204_v19 = vpop.f32.mrb[39].mxu1 }
 0x147   : > { %v1964_v0 = vadd.f32 %v3165_v13, %v4366_v16  ;;  %v2025_v20 = vadd.f32 %v3202_v17, %v1961_v62  ;;  %v3205_v7 = vadd.f32 %v3204_v19, %v3203_v18 }
 0x149   : > { %v2028_v21 = vadd.f32 %v3205_v7, %v1964_v0  ;;  %v3166_v22 = vpop.f32.mrb[40].mxu0 }
 0x14a   : > { %v3167_v9 = vpop.f32.mrb[41].mxu0 }
 0x14b   : > { %v3168_v23 = vadd.f32 %v3167_v9, %v3166_v22  ;;  %v3169_v24 = vpop.f32.mrb[42].mxu0  ;;  %v3206_v26 = vpop.f32.mrb[40].mxu1 }
 0x14c   : > { %v3170_v27 = vpop.f32.mrb[43].mxu0  ;;  %v3207_v14 = vpop.f32.mrb[41].mxu1 }
 0x14d   : > { %v1969_v29 = vadd.f32 %v3168_v23, %v4379_v33  ;;  %v3171_v30 = vadd.f32 %v3170_v27, %v3169_v24  ;;  %v3208_v31 = vadd.f32 %v3207_v14, %v3206_v26  ;;  %v3209_v32 = vpop.f32.mrb[42].mxu1 }
 0x14e   : > { %v3210_v35 = vpop.f32.mrb[43].mxu1 }
 0x14f   : > { %v1972_v34 = vadd.f32 %v3171_v30, %v4381_v25  ;;  %v2033_v16 = vadd.f32 %v3208_v31, %v1969_v29  ;;  %v3211_v28 = vadd.f32 %v3210_v35, %v3209_v32 }
 0x151   : > { %v2036_v36 = vadd.f32 %v3211_v28, %v1972_v34  ;;  %v3172_v38 = vpop.f32.mrb[44].mxu0 }
 0x152   : > { %v3173_v40 = vpop.f32.mrb[45].mxu0 }
 0x153   : > { %v3174_v42 = vadd.f32 %v3173_v40, %v3172_v38  ;;  %v3175_v43 = vpop.f32.mrb[46].mxu0  ;;  %v3212_v44 = vpop.f32.mrb[44].mxu1 }
 0x154   : > { %v3176_v46 = vpop.f32.mrb[47].mxu0  ;;  %v3213_v47 = vpop.f32.mrb[45].mxu1 }
 0x155   : > { %v1977_v41 = vadd.f32 %v3174_v42, %v1913_v50  ;;  %v3214_v48 = vadd.f32 %v3213_v47, %v3212_v44  ;;  %v3215_v33 = vpop.f32.mrb[46].mxu1 }
 0x156   : > { %v3216_v49 = vpop.f32.mrb[47].mxu1 }
 0x157   : > { %v2041_v51 = vadd.f32 %v3214_v48, %v1977_v41 }
 0x159   : > { %v3234_v52 = vpop.f32.mrb[48].mxu0 }
 0x15a   : > { %v3235_v53 = vpop.f32.mrb[49].mxu0 }
 0x15b   : > { %v3236_v45 = vadd.f32 %v3235_v53, %v3234_v52  ;;  %v3237_v25 = vpop.f32.mrb[50].mxu0  ;;  %v3274_v55 = vpop.f32.mrb[48].mxu1 }
 0x15c   : > { %v3238_v57 = vpop.f32.mrb[51].mxu0  ;;  %v3275_v60 = vpop.f32.mrb[49].mxu1 }
 0x15d   : > { %v2081_v58 = vadd.f32 %v3236_v45, %v2017_v3  ;;  %v3239_v59 = vadd.f32 %v3238_v57, %v3237_v25  ;;  %v3276_v61 = vadd.f32 %v3275_v60, %v3274_v55  ;;  %v3277_v63 = vpop.f32.mrb[50].mxu1 }
 0x15e   : > { %v3278_v54 = vpop.f32.mrb[51].mxu1 }
 0x15f   : > { %v2084_v1 = vadd.f32 %v3239_v59, %v2020_v5  ;;  %v2145_v2 = vadd.f32 %v3276_v61, %v2081_v58  ;;  %v3279_v4 = vadd.f32 %v3278_v54, %v3277_v63 }
 0x161   : > { %v3240_v50 = vpop.f32.mrb[52].mxu0  ;;  %v2148_v6 = vadd.f32 %v3279_v4, %v2084_v1 }
 0x162   : > { %v3241_v8 = vpop.f32.mrb[53].mxu0 }
 0x163   : > { %v3242_v10 = vadd.f32 %v3241_v8, %v3240_v50  ;;  %v3243_v11 = vpop.f32.mrb[54].mxu0  ;;  %v3280_v56 = vpop.f32.mrb[52].mxu1 }
 0x164   : > { %v3244_v12 = vpop.f32.mrb[55].mxu0  ;;  %v3281_v15 = vpop.f32.mrb[53].mxu1 }
 0x165   : > { %v2089_v62 = vadd.f32 %v3242_v10, %v2025_v20  ;;  %v3245_v13 = vadd.f32 %v3244_v12, %v3243_v11  ;;  %v3282_v17 = vadd.f32 %v3281_v15, %v3280_v56  ;;  %v3283_v3 = vpop.f32.mrb[54].mxu1 }
 0x166   : > { %v3284_v0 = vpop.f32.mrb[55].mxu1 }
 0x167   : > { %v2092_v18 = vadd.f32 %v3245_v13, %v2028_v21  ;;  %v2153_v19 = vadd.f32 %v3282_v17, %v2089_v62  ;;  %v3285_v7 = vadd.f32 %v3284_v0, %v3283_v3 }
 0x169   : > { %v3246_v5 = vpop.f32.mrb[56].mxu0  ;;  %v2156_v22 = vadd.f32 %v3285_v7, %v2092_v18 }
 0x16a   : > { %v3247_v9 = vpop.f32.mrb[57].mxu0 }
 0x16b   : > { %v3248_v23 = vadd.f32 %v3247_v9, %v3246_v5  ;;  %v3249_v24 = vpop.f32.mrb[58].mxu0  ;;  %v3286_v26 = vpop.f32.mrb[56].mxu1 }
 0x16c   : > { %v3250_v27 = vpop.f32.mrb[59].mxu0  ;;  %v3287_v14 = vpop.f32.mrb[57].mxu1 }
 0x16d   : > { %v2097_v29 = vadd.f32 %v3248_v23, %v2033_v16  ;;  %v3251_v30 = vadd.f32 %v3250_v27, %v3249_v24  ;;  %v3288_v31 = vadd.f32 %v3287_v14, %v3286_v26  ;;  %v3289_v20 = vpop.f32.mrb[58].mxu1 }
 0x16e   : > { %v3290_v34 = vpop.f32.mrb[59].mxu1 }
 0x16f   : > { %v2100_v32 = vadd.f32 %v3251_v30, %v2036_v36  ;;  %v2161_v35 = vadd.f32 %v3288_v31, %v2097_v29  ;;  %v3291_v28 = vadd.f32 %v3290_v34, %v3289_v20 }
 0x171   : > { %v3252_v21 = vpop.f32.mrb[60].mxu0  ;;  %v2164_v38 = vadd.f32 %v3291_v28, %v2100_v32 }
 0x172   : > { %v3253_v40 = vpop.f32.mrb[61].mxu0 }
 0x173   : > { %v3254_v42 = vadd.f32 %v3253_v40, %v3252_v21  ;;  %v3255_v43 = vpop.f32.mrb[62].mxu0  ;;  %v3292_v44 = vpop.f32.mrb[60].mxu1 }
 0x174   : > { %v3256_v46 = vpop.f32.mrb[63].mxu0  ;;  %v3293_v41 = vpop.f32.mrb[61].mxu1 }
 0x175   : > { %v2105_v47 = vadd.f32 %v3254_v42, %v2041_v51  ;;  %v3294_v48 = vadd.f32 %v3293_v41, %v3292_v44  ;;  %v3295_v33 = vpop.f32.mrb[62].mxu1 }
 0x176   : > { %v3296_v16 = vpop.f32.mrb[63].mxu1  ;;  %v3656_v33 = vld [vmem:[%s4447_s5 + $0x8] sm:$0xff]  }
 0x177   : > { %v2169_v49 = vadd.f32 %v3294_v48, %v2105_v47  ;;  %v3655_v48 = vld [vmem:[%s4447_s5] sm:$0xff]   ;;  %v3657_v16 = vld [vmem:[%s4447_s5 + $0x10] sm:$0xff]  }
 0x178   : > { %3443 = vmatprep.subr.bf16.mxu0 %v3655_v48 }
 0x179   : > { %v3314_v52 = vpop.f32.mrb[64].mxu0 }
 0x17a   : > { %v3315_v53 = vpop.f32.mrb[65].mxu0 }
 0x17b   : > { %v3316_v45 = vadd.f32 %v3315_v53, %v3314_v52  ;;  %v3317_v36 = vpop.f32.mrb[66].mxu0  ;;  %v3389_v55 = vpop.f32.mrb[64].mxu1  ;;  %v3659_v52 = vld [vmem:[%s4447_s5 + $0x20] sm:$0xff]   ;;  %v3660_v53 = vld [vmem:[%s4447_s5 + $0x28] sm:$0xff]  }
 0x17c   : > { %v3318_v25 = vpop.f32.mrb[67].mxu0  ;;  %v2272_v59 = vpop.f32.mrb[65].mxu1 }
 0x17d   : > { %v3319_v57 = vadd.f32 %v3318_v25, %v3317_v36  ;;  %v2209_v58 = vadd.f32 %v3316_v45, %v2145_v2  ;;  %v3390_v60 = vpop.f32.mrb[66].mxu1  ;;  %v2331_v45 = vsub.s32 1, %v4300_v37 }
 0x17e   : > { %v2275_v1 = vpop.f32.mrb[67].mxu1 }
 0x17f   : > { %v2273_v61 = vadd.f32 %v2272_v59, %v2209_v58  ;;  %v2212_v63 = vadd.f32 %v3319_v57, %v2148_v6  ;;  %v2332_v36 = vrot.slane %v4306_v39, %v2331_v45 }
 0x181   : > { %v2276_v54 = vadd.f32 %v2275_v1, %v2212_v63  ;;  %v3320_v51 = vpop.f32.mrb[68].mxu0  ;;  %v2302_v50 = vmax.f32 %v2273_v61, 0.0 }
 0x182   : > { %v3321_v4 = vpop.f32.mrb[69].mxu0 }
 0x183   : > { %v2303_v8 = vmax.f32 %v2276_v54, 0.0  ;;  %v3322_v10 = vadd.f32 %v3321_v4, %v3320_v51  ;;  %v3323_v11 = vpop.f32.mrb[70].mxu0  ;;  %v3393_v12 = vpop.f32.mrb[68].mxu1 }
 0x184   : > { %v3324_v56 = vpop.f32.mrb[71].mxu0  ;;  %v2288_v17 = vpop.f32.mrb[69].mxu1 }
 0x185   : > { %v2325_v62 = vpack.c.bf16 %v2303_v8, %v2302_v50  ;;  %v2217_v13 = vadd.f32 %v3322_v10, %v2153_v19  ;;  %v3325_v15 = vadd.f32 %v3324_v56, %v3323_v11  ;;  %v3394_v3 = vpop.f32.mrb[70].mxu1 }
 0x186   : > { %v2291_v0 = vpop.f32.mrb[71].mxu1 }
 0x187   : > { %v2281_v2 = vadd.f32 %v3389_v55, %v2217_v13  ;;  %v2220_v18 = vadd.f32 %v3325_v15, %v2156_v22  ;;  %3411 = vmatprep.mubr.bf16.mxu0 %v2325_v62 }
 0x189   : > { %v2284_v6 = vadd.f32 %v3390_v60, %v2220_v18  ;;  %v3326_v7 = vpop.f32.mrb[72].mxu0  ;;  %v2304_v9 = vmax.f32 %v2281_v2, 0.0 }
 0x18a   : > { %v3327_v5 = vpop.f32.mrb[73].mxu0 }
 0x18b   : > { %v2305_v23 = vmax.f32 %v2284_v6, 0.0  ;;  %v3328_v24 = vadd.f32 %v3327_v5, %v3326_v7  ;;  %v3329_v26 = vpop.f32.mrb[74].mxu0  ;;  %v3661_v6 = vld [vmem:[%s4447_s5 + $0x30] sm:$0xff]   ;;  %v3662_v7 = vld [vmem:[%s4447_s5 + $0x38] sm:$0xff]   ;;  %v2474_v5 = vsub.s32 2, %v4300_v37 }
 0x18c   : > { %v3330_v27 = vpop.f32.mrb[75].mxu0 }
 0x18d   : > { %v2326_v29 = vpack.c.bf16 %v2305_v23, %v2304_v9  ;;  %v3331_v30 = vadd.f32 %v3330_v27, %v3329_v26  ;;  %v2225_v14 = vadd.f32 %v3328_v24, %v2161_v35  ;;  %v3653_v35 = vld [vmem:[%s4446_s4 + $0x30] sm:$0xff]   ;;  %v2475_v9 = vrot.slane %v4306_v39, %v2474_v5 }
 0x18e   : > { %3431 = vmatprep.subr.bf16.mxu1 %v3653_v35 }
 0x18f   : > { %v2289_v31 = vadd.f32 %v2288_v17, %v2225_v14  ;;  %3412 = vmatmul.mubr.bf16.vlgmr.msra.gmra.mrb[80].mxu0 %v2326_v29  ;;  %v2228_v19 = vadd.f32 %v3331_v30, %v2164_v38  ;;  %3432 = vmatpush3.bf16.msra.mxu1 %v3653_v35  ;;  %v3654_v38 = vld [vmem:[%s4446_s4 + $0x38] sm:$0xff]  }
 0x190   : > { %3433 = vmatprep.subr.bf16.mxu1 %v3654_v38  ;;  %3444 = vmatpush3.bf16.msra.mxu0 %v3655_v48 }
 0x191   : > { %v2292_v20 = vadd.f32 %v2291_v0, %v2228_v19  ;;  %v3332_v32 = vpop.f32.mrb[76].mxu0  ;;  %v2306_v22 = vmax.f32 %v2289_v31, 0.0  ;;  %3445 = vmatprep.subr.bf16.mxu0 %v3656_v33 }
 0x192   : > { %v3333_v34 = vpop.f32.mrb[77].mxu0 }
 0x193   : > { %v2307_v28 = vmax.f32 %v2292_v20, 0.0  ;;  %v3334_v21 = vadd.f32 %v3333_v34, %v3332_v32  ;;  %v3335_v40 = vpop.f32.mrb[78].mxu0  ;;  %3434 = vmatpush3.bf16.msra.mxu1 %v3654_v38 }
 0x194   : > { %v3336_v42 = vpop.f32.mrb[79].mxu0  ;;  %3467 = vmatprep.subr.bf16.mxu1 %v3655_v48  ;;  %3446 = vmatpush3.bf16.msra.mxu0 %v3656_v33 }
 0x195   : > { %v2327_v43 = vpack.c.bf16 %v2307_v28, %v2306_v22  ;;  %v2233_v44 = vadd.f32 %v3334_v21, %v2169_v49  ;;  %3447 = vmatprep.subr.bf16.mxu0 %v3657_v16  ;;  %v3658_v49 = vld [vmem:[%s4447_s5 + $0x18] sm:$0xff]  }
 0x197   : > { %v2297_v46 = vadd.f32 %v3393_v12, %v2233_v44  ;;  %3415 = vmatprep.mubr.bf16.mxu0 %v2327_v43 }
 0x198   : > { %3448 = vmatpush3.bf16.msra.mxu0 %v3657_v16 }
 0x199   : > { %v2308_v47 = vmax.f32 %v2297_v46, 0.0  ;;  %3449 = vmatprep.subr.bf16.mxu0 %v3658_v49 }
 0x19b   : > { %v2328_v41 = vpack.c.bf16 %v2308_v47, %v2308_v47 }
 0x19c   : > { %3450 = vmatpush3.bf16.msra.mxu0 %v3658_v49 }
 0x19d   : > { %3416 = vmatmul.mubr.bf16.gmra.mrb[84].mxu0 %v2328_v41  ;;  %3451 = vmatprep.subr.bf16.mxu0 %v3659_v52 }
 0x1a0   : > { %3452 = vmatpush3.bf16.msra.mxu0 %v3659_v52 }
 0x1a1   : > { %3453 = vmatprep.subr.bf16.mxu0 %v3660_v53 }
 0x1a4   : > { %3454 = vmatpush3.bf16.msra.mxu0 %v3660_v53 }
 0x1a5   : > { %3455 = vmatprep.subr.bf16.mxu0 %v3661_v6 }
 0x1a8   : > { %3456 = vmatpush3.bf16.msra.mxu0 %v3661_v6 }
 0x1a9   : > { %3457 = vmatprep.subr.bf16.mxu0 %v3662_v7 }
 0x1ac   : > { %3458 = vmatpush3.bf16.msra.mxu0 %v3662_v7 }
 0x262   : > { %v3413_v25 = vpop.f32.mrb[80].mxu0 }
 0x263   : > { %v2424_v55 = vadd.f32 %v3413_v25, %v2332_v36  ;;  %v2415_v57 = vpop.f32.mrb[81].mxu0 }
 0x264   : > { %v2416_v58 = vadd.f32 %v2415_v57, %v2332_v36  ;;  %v3414_v59 = vpop.f32.mrb[82].mxu0 }
 0x265   : > { %v2427_v60 = vadd.f32 %v3414_v59, %v2332_v36  ;;  %v2418_v61 = vpop.f32.mrb[83].mxu0  ;;  %v2447_v1 = vmax.f32 %v2424_v55, 0.0 }
 0x266   : > { %v2419_v63 = vadd.f32 %v2418_v61, %v2332_v36  ;;  %v2445_v51 = vmax.f32 %v2416_v58, 0.0 }
 0x267   : > { %v2448_v54 = vmax.f32 %v2427_v60, 0.0 }
 0x268   : > { %v2446_v4 = vmax.f32 %v2419_v63, 0.0 }
 0x269   : > { %v2469_v50 = vpack.c.bf16 %v2448_v54, %v2447_v1 }
 0x26a   : > { %v2468_v8 = vpack.c.bf16 %v2446_v4, %v2445_v51 }
 0x26c   : > { %3435 = vmatprep.mubr.bf16.mxu1 %v2468_v8 }
 0x26d   : > { %3436 = vmatmul.mubr.bf16.vlgmr.msra.gmra.mrb[72].mxu1 %v2469_v50 }
 0x26e   : > { %3475 = vmatpush3.bf16.msra.mxu1 %v3655_v48 }
 0x26f   : > { %3468 = vmatprep.subr.bf16.mxu1 %v3656_v33 }
 0x270   : > { %v3417_v10 = vpop.f32.mrb[84].mxu0 }
 0x271   : > { %v2440_v11 = vadd.f32 %v3417_v10, %v2332_v36  ;;  %v2431_v56 = vpop.f32.mrb[85].mxu0 }
 0x272   : > { %v2432_v12 = vadd.f32 %v2431_v56, %v2332_v36  ;;  %v3418_v62 = vpop.f32.mrb[86].mxu0  ;;  %3476 = vmatpush3.bf16.msra.mxu1 %v3656_v33 }
 0x273   : > { %v2434_v13 = vpop.f32.mrb[87].mxu0  ;;  %3469 = vmatprep.subr.bf16.mxu1 %v3657_v16  ;;  %v2451_v17 = vmax.f32 %v2440_v11, 0.0 }
 0x274   : > { %v2435_v15 = vadd.f32 %v2434_v13, %v2332_v36  ;;  %v2449_v3 = vmax.f32 %v2432_v12, 0.0 }
 0x275   : > { %v2471_v0 = vpack.c.bf16 %v2451_v17, %v2451_v17 }
 0x276   : > { %v2450_v2 = vmax.f32 %v2435_v15, 0.0  ;;  %3477 = vmatpush3.bf16.msra.mxu1 %v3657_v16  ;;  %v2617_v16 = vsub.s32 3, %v4300_v37 }
 0x277   : > { %3470 = vmatprep.subr.bf16.mxu1 %v3658_v49 }
 0x278   : > { %v2470_v18 = vpack.c.bf16 %v2450_v2, %v2449_v3 }
 0x27a   : > { %3439 = vmatprep.mubr.bf16.mxu1 %v2470_v18  ;;  %3478 = vmatpush3.bf16.msra.mxu1 %v3658_v49  ;;  %v2618_v49 = vrot.slane %v4306_v39, %v2617_v16 }
 0x27b   : > { %3440 = vmatmul.mubr.bf16.gmra.mrb[76].mxu1 %v2471_v0  ;;  %3471 = vmatprep.subr.bf16.mxu1 %v3659_v52 }
 0x27e   : > { %3479 = vmatpush3.bf16.msra.mxu1 %v3659_v52 }
 0x27f   : > { %3472 = vmatprep.subr.bf16.mxu1 %v3660_v53 }
 0x282   : > { %3480 = vmatpush3.bf16.msra.mxu1 %v3660_v53 }
 0x283   : > { %3473 = vmatprep.subr.bf16.mxu1 %v3661_v6 }
 0x286   : > { %3481 = vmatpush3.bf16.msra.mxu1 %v3661_v6 }
 0x287   : > { %3474 = vmatprep.subr.bf16.mxu1 %v3662_v7 }
 0x28a   : > { %3482 = vmatpush3.bf16.msra.mxu1 %v3662_v7 }
 0x340   : > { %v3437_v23 = vpop.f32.mrb[72].mxu1 }
 0x341   : > { %v2567_v24 = vadd.f32 %v3437_v23, %v2475_v9  ;;  %v2558_v26 = vpop.f32.mrb[73].mxu1 }
 0x342   : > { %v2559_v27 = vadd.f32 %v2558_v26, %v2475_v9  ;;  %v3438_v29 = vpop.f32.mrb[74].mxu1 }
 0x343   : > { %v2570_v30 = vadd.f32 %v3438_v29, %v2475_v9  ;;  %v2561_v14 = vpop.f32.mrb[75].mxu1  ;;  %v2590_v19 = vmax.f32 %v2567_v24, 0.0 }
 0x344   : > { %v2562_v31 = vadd.f32 %v2561_v14, %v2475_v9  ;;  %v2588_v32 = vmax.f32 %v2559_v27, 0.0 }
 0x345   : > { %v2591_v20 = vmax.f32 %v2570_v30, 0.0 }
 0x346   : > { %v2589_v34 = vmax.f32 %v2562_v31, 0.0 }
 0x347   : > { %v2612_v22 = vpack.c.bf16 %v2591_v20, %v2590_v19 }
 0x348   : > { %v2611_v28 = vpack.c.bf16 %v2589_v34, %v2588_v32 }
 0x34a   : > { %3459 = vmatprep.mubr.bf16.mxu0 %v2611_v28 }
 0x34b   : > { %3460 = vmatmul.mubr.bf16.vlgmr.msra.gmra.mrb[88].mxu0 %v2612_v22 }
 0x34e   : > { %v3441_v21 = vpop.f32.mrb[76].mxu1 }
 0x34f   : > { %v2583_v40 = vadd.f32 %v3441_v21, %v2475_v9  ;;  %v2574_v42 = vpop.f32.mrb[77].mxu1 }
 0x350   : > { %v2575_v43 = vadd.f32 %v2574_v42, %v2475_v9  ;;  %v3442_v44 = vpop.f32.mrb[78].mxu1 }
 0x351   : > { %v2577_v46 = vpop.f32.mrb[79].mxu1  ;;  %v2594_v41 = vmax.f32 %v2583_v40, 0.0 }
 0x352   : > { %v2578_v47 = vadd.f32 %v2577_v46, %v2475_v9  ;;  %v2592_v35 = vmax.f32 %v2575_v43, 0.0 }
 0x353   : > { %v2614_v33 = vpack.c.bf16 %v2594_v41, %v2594_v41 }
 0x354   : > { %v2593_v38 = vmax.f32 %v2578_v47, 0.0 }
 0x356   : > { %v2613_v48 = vpack.c.bf16 %v2593_v38, %v2592_v35 }
 0x358   : > { %3463 = vmatprep.mubr.bf16.mxu1 %v2613_v48 }
 0x359   : > { %3464 = vmatmul.mubr.bf16.vlgmr.msra.gmra.mrb[80].mxu1 %v2614_v33 }
 0x41e   : > { %v3461_v52 = vpop.f32.mrb[88].mxu0 }
 0x41f   : > { %v2710_v53 = vadd.f32 %v3461_v52, %v2618_v49  ;;  %v2701_v45 = vpop.f32.mrb[89].mxu0 }
 0x420   : > { %v2702_v36 = vadd.f32 %v2701_v45, %v2618_v49  ;;  %v3462_v25 = vpop.f32.mrb[90].mxu0 }
 0x421   : > { %2733 = vst [vmem:[%s256_s9 + $0x10] sm:$0xff] %v2710_v53  ;;  %v2713_v55 = vadd.f32 %v3462_v25, %v2618_v49  ;;  %v2704_v57 = vpop.f32.mrb[91].mxu0 }
 0x422   : > { %2731 = vst [vmem:[%s256_s9] sm:$0xff] %v2702_v36  ;;  %v2705_v58 = vadd.f32 %v2704_v57, %v2618_v49 }
 0x423   : > { %2734 = vst [vmem:[%s256_s9 + $0x18] sm:$0xff] %v2713_v55 }
 0x424   : > { %2732 = vst [vmem:[%s256_s9 + $0x8] sm:$0xff] %v2705_v58 }
 0x42c   : > { %v3465_v37 = vpop.f32.mrb[80].mxu1 }
 0x42d   : > { %v2726_v59 = vadd.f32 %v3465_v37, %v2618_v49  ;;  %v2717_v60 = vpop.f32.mrb[81].mxu1 }
 0x42e   : > { %v2718_v39 = vadd.f32 %v2717_v60, %v2618_v49  ;;  %v3466_v61 = vpop.f32.mrb[82].mxu1 }
 0x42f   : > { %2737 = vst [vmem:[%s256_s9 + $0x30] sm:$0xff] %v2726_v59  ;;  %v2720_v63 = vpop.f32.mrb[83].mxu1 }
 0x430   : > { %2735 = vst [vmem:[%s256_s9 + $0x20] sm:$0xff] %v2718_v39  ;;  %v2721_v1 = vadd.f32 %v2720_v63, %v2618_v49 }
 0x432   : > { %2736 = vst [vmem:[%s256_s9 + $0x28] sm:$0xff] %v2721_v1 }
 0x433 PF: > { %s16_s21 = sadd.s32 1, %s3669_s21  }
 0x434   : > { %p13_p4 = scmp.ge.s32.totalorder %s16_s21, 4  }
 0x436   :  { %15 = sbr.rel (!%p13_p4) target bundleno = 1 (0x1), region = 74 }

</bundles_post_ra>
